<compile_context>
chip_gen: v7x
topology: tpu7x:2x2x1
jax: 0.10.0
libtpu: 0.0.40
codegen_flags: <defaults>
</compile_context>

<pallas_src>
import functools

import jax
import jax.numpy as jnp
from jax import lax
from jax.experimental import pallas as pl
from jax.experimental.pallas import tpu as pltpu


_LANE = 128
_FALLBACK_VMEM_BYTES = 64 * 1024 * 1024   # conservative default (v7x per-TC)
_RESIDENT_FRACTION = 0.55                 # of physical VMEM for the resident adj^T
_STREAM_FRACTION = 0.30                   # of physical VMEM for streaming tile buffers
_VMEM_LIMIT_FRACTION = 0.85               # cap on vmem_limit_bytes
_NUM_STREAM_BUFS = 3                      # depth-2 prefetch while computing


def _round_up(a, m):
    return ((a + m - 1) // m) * m


def _vmem_capacity_bytes():
    """Physical VMEM of the attached TPU generation (fallback: 64 MiB)."""
    try:
        info = pltpu.get_tpu_info()
        cap = getattr(info, "vmem_capacity_bytes", None)
        if cap:
            return int(cap)
    except Exception:
        pass
    return _FALLBACK_VMEM_BYTES


def _pick_col_block(n_pad, max_blk=1024):
    """Largest multiple of 128 that divides n_pad and is <= max_blk."""
    best = _LANE
    m = n_pad // _LANE
    for d in range(1, min(m, max_blk // _LANE) + 1):
        if m % d == 0:
            best = _LANE * d
    return best


def _full_spec(shape):
    nd = len(shape)
    return pl.BlockSpec(shape, lambda i, _nd=nd: (0,) * _nd)


# ----------------------------- Pallas kernel ------------------------------ #

def _sdcn_kernel(xT_ref, adjT_hbm, w1T_ref, w2T_ref, w3T_ref, w4T_ref,
                 w5fc1T_ref, fc1bT_ref, fc2wT_ref, fc2bT_ref, mu_ref,
                 xbarT_ref, qT_ref, predT_ref,
                 abuf, dma_sem, sup_sc, hrelu_sc, sup5_sc,
                 *, v, col_blk, stream_unrolled):
    f32 = jnp.float32
    bf16 = jnp.bfloat16

    n_pad = xT_ref.shape[1]
    resident = len(abuf.shape) == 2                 # resident: abuf == full adj^T
    tile_rows = n_pad if resident else abuf.shape[1]
    num_tiles = adjT_hbm.shape[0] // tile_rows      # static python int

    # ------------------ adjacency DMA machinery (bf16 adj^T in HBM) -------- #
    def _start_tile(r, slot):
        start = r * tile_rows
        if not isinstance(start, int):
            start = pl.multiple_of(start, _LANE)
        pltpu.make_async_copy(adjT_hbm.at[pl.ds(start, tile_rows), :],
                              abuf.at[slot], dma_sem.at[slot]).start()

    def _wait_tile(slot):
        # wait only depends on the destination / semaphore; use a fixed src view
        pltpu.make_async_copy(adjT_hbm.at[pl.ds(0, tile_rows), :],
                              abuf.at[slot], dma_sem.at[slot]).wait()

    if resident:
        # adj^T fits in one VMEM buffer: DMA it once (overlapped with the first
        # support matmul) and reuse it across all five adjacency passes.
        _res_cp = pltpu.make_async_copy(adjT_hbm, abuf, dma_sem.at[0])
        _res_cp.start()
        _res_state = {"waited": False}

    def _prime():
        # Depth-2 prefetch: issue the first two tile DMAs before the (adj-
        # independent) support matmul / head loop of each adjacency pass.
        if not resident:
            _start_tile(0, 0)
            if num_tiles > 1:
                _start_tile(1, 1)

    def _apply_adjT(supportT):
        """Return supportT @ adj^T  (== (adj @ support)^T), f32 accumulation."""
        s_bf = supportT.astype(bf16)
        if resident:
            if not _res_state["waited"]:
                _res_cp.wait()
                _res_state["waited"] = True
            return jnp.dot(s_bf, abuf[...], preferred_element_type=f32)

        rows = s_bf.shape[0]
        if stream_unrolled:
            # Static unroll (few tiles): best LLO scheduling visibility.
            acc = jnp.zeros((rows, n_pad), f32)
            for r in range(num_tiles):
                slot = r % _NUM_STREAM_BUFS
                _wait_tile(slot)
                if r + 2 < num_tiles:
                    _start_tile(r + 2, (r + 2) % _NUM_STREAM_BUFS)
                acc = acc + jnp.dot(s_bf[:, r * tile_rows:(r + 1) * tile_rows],
                                    abuf[slot], preferred_element_type=f32)
            return acc

        # Many tiles: lax.fori_loop with the support staged in VMEM scratch so
        # the body can slice it at a dynamic (pl.ds) column offset.
        sup_sc[0:rows, :] = s_bf

        def body(r, acc):
            slot = r % _NUM_STREAM_BUFS
            _wait_tile(slot)

            @pl.when(r + 2 < num_tiles)
            def _():
                _start_tile(r + 2, (r + 2) % _NUM_STREAM_BUFS)

            tile = sup_sc[0:rows,
                          pl.ds(pl.multiple_of(r * tile_rows, _LANE), tile_rows)]
            return acc + jnp.dot(tile, abuf[slot], preferred_element_type=f32)

        return lax.fori_loop(0, num_tiles, body, jnp.zeros((rows, n_pad), f32))

    def gnn(hT_bf, wT_ref, active=True):
        _prime()
        supportT = jnp.dot(wT_ref[...], hT_bf, preferred_element_type=f32)
        outT = _apply_adjT(supportT)
        return jnp.maximum(outT, 0.0) if active else outT

    # -------------- GNN encoder chain (node-minor, lane-dense) -------------- #
    h = gnn(xT_ref[...], w1T_ref)                        # [n_enc_1, n_pad]
    h = gnn(h.astype(bf16), w2T_ref)                     # [n_enc_2, n_pad]
    h = gnn(h.astype(bf16), w3T_ref)                     # [n_enc_3, n_pad]
    h = gnn(h.astype(bf16), w4T_ref, active=False)       # [n_z, n_pad] pre-relu, f32
    hrelu_sc[...] = jnp.maximum(h, 0.0).astype(bf16)     # staged for the head loop

    # ------------- Student-t soft assignment q (matmul form, f32) ----------- #
    K = mu_ref.shape[0]
    mu = mu_ref[...]                                     # [K, n_z] f32
    hh = jnp.sum(h * h, axis=0, keepdims=True)           # [1, n_pad]
    mm = jnp.sum(mu * mu, axis=1, keepdims=True)         # [K, 1]
    cross = jnp.dot(mu.astype(bf16), h.astype(bf16),     # bf16 MXU, f32 accumulate
                    preferred_element_type=f32)          # [K, n_pad]
    d2 = jnp.maximum(hh + mm - 2.0 * cross, 0.0)         # clamp tiny negatives
    q = pl.reciprocal(1.0 + d2 * (1.0 / v), approx=True)
    expo = (v + 1.0) / 2.0
    if expo != 1.0:                                      # static: skip pow for v == 1
        q = q ** expo
    qT_ref[...] = q * pl.reciprocal(jnp.sum(q, axis=0, keepdims=True), approx=True)

    # ---- head: fused (W5 | fc1) + decoder, column-tiled over node blocks ---- #
    fc_hidden = fc1bT_ref.shape[0]
    k_pad = w5fc1T_ref.shape[0] - fc_hidden

    w5fc1 = w5fc1T_ref[...]                              # hoisted small weight reads
    fc1b = fc1bT_ref[...]
    fc2w = fc2wT_ref[...]
    fc2b = fc2bT_ref[...]

    _prime()   # start streaming adj^T tiles for the h5 pass under the head loop

    num_col_blocks = n_pad // col_blk

    @pl.loop(0, num_col_blocks)
    def _(c):
        cols = pl.ds(pl.multiple_of(c * col_blk, _LANE), col_blk)
        hr_blk = hrelu_sc[:, cols]                                   # [n_z, blk]
        combo = jnp.dot(w5fc1, hr_blk, preferred_element_type=f32)   # [k_pad+FH, blk]
        sup5_sc[:, cols] = combo[0:k_pad, :].astype(bf16)            # gnn_5 support
        deco = jnp.maximum(combo[k_pad:, :] + fc1b, 0.0).astype(bf16)
        xb = jnp.dot(fc2w, deco, preferred_element_type=f32) + fc2b
        xbarT_ref[:, cols] = jnp.maximum(xb, 0.0)

    # h5 = adj @ (relu(h) @ W5)  (no relu);  predict = softmax over clusters.
    h5T = _apply_adjT(sup5_sc[...])[0:K, :]              # [K, n_pad]
    m = jnp.max(h5T, axis=0, keepdims=True)
    e = jnp.exp(h5T - m)
    predT_ref[...] = e * pl.reciprocal(jnp.sum(e, axis=0, keepdims=True), approx=True)


# ------------------------------- Wrapper ----------------------------------- #

def sdcn_forward(x, adj, params, v=1.0, tile_rows=None, col_block=None,
                 max_unrolled_tiles=8):
    """Fused SDCN forward.  Returns (x_bar, q, predict, z=0, adj_bar=0)."""
    N, n_input = x.shape
    assert adj.shape == (N, N)
    K, n_z = params["mu"].shape
    fc_hidden = params["fc1_w"].shape[1]
    k_pad = _round_up(K, 8)

    f32, bf16 = jnp.float32, jnp.bfloat16

    # ---------------- generation-aware VMEM budgets ---------------- #
    vmem_cap = _vmem_capacity_bytes()
    adj_resident_budget = int(_RESIDENT_FRACTION * vmem_cap)
    adj_stream_budget = int(_STREAM_FRACTION * vmem_cap)

    # ---- choose adjacency tiling (resident fast path if bf16 adj^T fits) ---- #
    n_pad0 = _round_up(N, _LANE)
    if tile_rows is None:
        if 2 * n_pad0 * n_pad0 <= adj_resident_budget:
            tile_rows = n_pad0
        else:
            per_row = _NUM_STREAM_BUFS * 2 * n_pad0      # bytes per streamed row
            tile_rows = max(_LANE, (adj_stream_budget // per_row) // _LANE * _LANE)
            tile_rows = min(tile_rows, n_pad0)
    tile_rows = max(_LANE, _round_up(int(tile_rows), _LANE))
    n_pad = _round_up(N, tile_rows)
    num_tiles = n_pad // tile_rows
    resident = num_tiles == 1
    use_fori = (not resident) and (num_tiles > int(max_unrolled_tiles))
    stream_unrolled = not use_fori

    # ---- head column-block size (divides n_pad, multiple of 128) ---- #
    if col_block is not None:
        cb = min(max(_LANE, _round_up(int(col_block), _LANE)), n_pad)
        col_blk = cb if n_pad % cb == 0 else _pick_col_block(n_pad)
    else:
        col_blk = _pick_col_block(n_pad)

    pad = n_pad - N

    # ---- node-minor (transposed, lane-dense) operands; bf16 MXU inputs ---- #
    # (single fused pad + transpose + cast — no extra f32 round-trip)
    xT = jnp.pad(x, ((0, pad), (0, 0))).T.astype(bf16)                # [n_input, n_pad]
    adjT = jnp.pad(adj, ((0, pad), (0, pad))).T.astype(bf16)          # [n_pad, n_pad]
    w1T = params["w1"].T.astype(bf16)
    w2T = params["w2"].T.astype(bf16)
    w3T = params["w3"].T.astype(bf16)
    w4T = params["w4"].T.astype(bf16)
    # Fused (W5 | fc1) weight: rows [0:K] = W5^T, rows [k_pad:] = fc1_w^T.
    w5fc1 = jnp.zeros((k_pad + fc_hidden, n_z), f32)
    w5fc1 = w5fc1.at[:K].set(params["w5"].T)
    w5fc1 = w5fc1.at[k_pad:].set(params["fc1_w"].T)
    w5fc1T = w5fc1.astype(bf16)
    fc1bT = params["fc1_b"].reshape(fc_hidden, 1).astype(f32)
    fc2wT = params["fc2_w"].T.astype(bf16)
    fc2bT = params["fc2_b"].reshape(n_input, 1).astype(f32)
    mu = params["mu"].astype(f32)

    inputs = (xT, adjT, w1T, w2T, w3T, w4T, w5fc1T, fc1bT, fc2wT, fc2bT, mu)

    out_shapes = (
        jax.ShapeDtypeStruct((n_input, n_pad), f32),     # x_bar^T
        jax.ShapeDtypeStruct((K, n_pad), f32),           # q^T
        jax.ShapeDtypeStruct((K, n_pad), f32),           # predict^T
    )

    in_specs = ([_full_spec(xT.shape),
                 pl.BlockSpec(memory_space=pl.ANY)]      # adj^T stays in HBM
                + [_full_spec(a.shape) for a in inputs[2:]])
    out_specs = [_full_spec(s.shape) for s in out_shapes]

    # ---- scratch: adj buffers + DMA sems + staging + head scratches ---- #
    e1, e2, e3 = params["w1"].shape[1], params["w2"].shape[1], params["w3"].shape[1]
    max_w_pad = _round_up(max(e1, e2, e3, n_z, k_pad), 8)
    if resident:
        abuf_spec = pltpu.VMEM((n_pad, n_pad), bf16)
        sem_spec = pltpu.SemaphoreType.DMA((1,))
    else:
        abuf_spec = pltpu.VMEM((_NUM_STREAM_BUFS, tile_rows, n_pad), bf16)
        sem_spec = pltpu.SemaphoreType.DMA((_NUM_STREAM_BUFS,))
    sup_sc_spec = (pltpu.VMEM((max_w_pad, n_pad), bf16) if use_fori
                   else pltpu.VMEM((8, _LANE), bf16))    # unused dummy otherwise
    hrelu_spec = pltpu.VMEM((n_z, n_pad), bf16)
    sup5_spec = pltpu.VMEM((k_pad, n_pad), bf16)

    # ---- advisory cost estimate (dominated by the N^2 adjacency matmuls) ---- #
    flops = 2 * n_pad * n_pad * (e1 + e2 + e3 + n_z + k_pad)
    flops += 2 * n_pad * (n_input * e1 + e1 * e2 + e2 * e3 + e3 * n_z
                          + n_z * (k_pad + fc_hidden) + fc_hidden * n_input + n_z * K)
    bytes_adj = 2 * n_pad * n_pad * (1 if resident else 5)
    bytes_acc = (bytes_adj + int(xT.size) * 2
                 + sum(int(a.size) * a.dtype.itemsize for a in inputs[2:])
                 + (n_input + 2 * K) * n_pad * 4)
    cost = pl.CostEstimate(flops=int(flops),
                           transcendentals=int(n_pad * (3 * K + 4)),
                           bytes_accessed=int(bytes_acc))

    # ---- explicit scoped-VMEM limit derived from the physical capacity ---- #
    adj_vmem = 2 * n_pad * n_pad if resident else _NUM_STREAM_BUFS * 2 * tile_rows * n_pad
    act_vmem = 4 * n_pad * (e1 + e2 + e3 + 2 * n_z)
    head_vmem = 2 * col_blk * (4 * (k_pad + fc_hidden) + 2 * fc_hidden + 4 * n_input)
    scr_vmem = 2 * n_pad * (n_z + k_pad) + (2 * max_w_pad * n_pad if use_fori else 2048)
    out_vmem = 4 * n_pad * (n_input + 2 * K)
    in_vmem = 2 * (int(xT.size) * 2
                   + sum(int(a.size) * a.dtype.itemsize for a in inputs[2:]))
    vmem_est = adj_vmem + act_vmem + head_vmem + scr_vmem + out_vmem + in_vmem + (4 << 20)
    vmem_limit = int(min(max(int(1.5 * vmem_est), 32 * 2**20),
                         int(_VMEM_LIMIT_FRACTION * vmem_cap)))

    kernel = functools.partial(_sdcn_kernel, v=float(v), col_blk=int(col_blk),
                               stream_unrolled=bool(stream_unrolled))

    xbarT, qT, predT = pl.pallas_call(
        kernel,
        out_shape=out_shapes,
        grid=(1,),
        in_specs=in_specs,
        out_specs=out_specs,
        scratch_shapes=[abuf_spec, sem_spec, sup_sc_spec, hrelu_spec, sup5_spec],
        compiler_params=pltpu.CompilerParams(
            dimension_semantics=("arbitrary",),
            vmem_limit_bytes=vmem_limit),
        cost_estimate=cost,
    )(*inputs)

    # Transpose / slice the small lane-dense outputs back to node-major.
    x_bar = xbarT.T[:N]
    q = qT.T[:N]
    predict = predT.T[:N]
    # z and adj_bar are literally 0 in the reference forward (AE branch unused).
    z = jnp.float32(0.0)
    adj_bar = jnp.float32(0.0)
    return x_bar, q, predict, z, adj_bar


# --------------------------- Parameter creation ----------------------------- #

def _xavier_uniform(key, fan_in, fan_out):
    limit = (6.0 / (fan_in + fan_out)) ** 0.5
    return jax.random.uniform(key, (fan_in, fan_out), jnp.float32, -limit, limit)


def _xavier_normal(key, rows, cols):
    std = (2.0 / (rows + cols)) ** 0.5
    return std * jax.random.normal(key, (rows, cols), jnp.float32)


def init_sdcn_params(key, n_enc_1, n_enc_2, n_enc_3, n_input, n_z, n_clusters,
                     fc_hidden=500):
    ks = jax.random.split(key, 10)
    return {
        # GNN layer weights (torch GNNLayer: [in, out], xavier_uniform)
        "w1": _xavier_uniform(ks[0], n_input, n_enc_1),
        "w2": _xavier_uniform(ks[1], n_enc_1, n_enc_2),
        "w3": _xavier_uniform(ks[2], n_enc_2, n_enc_3),
        "w4": _xavier_uniform(ks[3], n_enc_3, n_z),
        "w5": _xavier_uniform(ks[4], n_z, n_clusters),
        # fc layers stored as [in, out]; biases kept 2-D [1, out]
        "fc1_w": _xavier_uniform(ks[5], n_z, fc_hidden),
        "fc1_b": 0.05 * jax.random.normal(ks[6], (1, fc_hidden), jnp.float32),
        "fc2_w": _xavier_uniform(ks[7], fc_hidden, n_input),
        "fc2_b": 0.05 * jax.random.normal(ks[8], (1, n_input), jnp.float32),
        # cluster centers (xavier_normal, [n_clusters, n_z])
        "mu": _xavier_normal(ks[9], n_clusters, n_z),
    }


# --------------------------- Pure-JAX reference ----------------------------- #

def sdcn_reference(x, adj, params, v=1.0):
    def gnn(h, w, active=True):
        out = adj @ (h @ w)
        return jnp.maximum(out, 0.0) if active else out

    h = gnn(x, params["w1"])
    h = gnn(h, params["w2"])
    h = gnn(h, params["w3"])
    h = gnn(h, params["w4"], active=False)
    hr = jnp.maximum(h, 0.0)
    h5 = gnn(hr, params["w5"], active=False)
    predict = jax.nn.softmax(h5, axis=1)
    deco = hr @ params["fc1_w"] + params["fc1_b"]
    x_bar = jnp.maximum(deco, 0.0) @ params["fc2_w"] + params["fc2_b"]
    x_bar = jnp.maximum(x_bar, 0.0)
    d2 = jnp.sum((h[:, None, :] - params["mu"][None, :, :]) ** 2, axis=2)
    q = 1.0 / (1.0 + d2 / v)
    q = q ** ((v + 1.0) / 2.0)
    q = q / jnp.sum(q, axis=1, keepdims=True)
    return x_bar, q, predict


# ---------------------------------- Demo ------------------------------------ #

def _make_inputs(key, N, n_input):
    k_x, k_adj = jax.random.split(key)
    x = jax.random.normal(k_x, (N, n_input), jnp.float32)
    a = jax.random.uniform(k_adj, (N, N), jnp.float32)
    a = (a > 0.7).astype(jnp.float32) + jnp.eye(N, dtype=jnp.float32)
    adj = a / jnp.sum(a, axis=1, keepdims=True)   # dense row-normalized adjacency
    return x, adj


if __name__ == "__main__":
    n_enc_1, n_enc_2, n_enc_3 = 64, 32, 16
    n_input, n_z, n_clusters = 32, 8, 4

    key = jax.random.PRNGKey(0)
    k_params, k_data = jax.random.split(key)
    params = init_sdcn_params(k_params, n_enc_1, n_enc_2, n_enc_3,
                              n_input, n_z, n_clusters)

    def check(tag, N, v, tile_rows=None, col_block=None, max_unrolled_tiles=8):
        x, adj = _make_inputs(jax.random.fold_in(k_data, N), N, n_input)
        x_bar, q, predict, z, adj_bar = sdcn_forward(
            x, adj, params, v=v, tile_rows=tile_rows, col_block=col_block,
            max_unrolled_tiles=max_unrolled_tiles)
        jax.block_until_ready((x_bar, q, predict))
        assert x_bar.shape == (N, n_input)
        assert q.shape == (N, n_clusters)
        assert predict.shape == (N, n_clusters)
        assert bool(jnp.allclose(jnp.sum(q, axis=1), 1.0, atol=1e-2)), tag
        assert bool(jnp.allclose(jnp.sum(predict, axis=1), 1.0, atol=1e-2)), tag
        rx, rq, rp = sdcn_reference(x, adj, params, v=v)
        for name, a, b in (("x_bar", x_bar, rx), ("q", q, rq), ("predict", predict, rp)):
            ok = bool(jnp.allclose(a, b, atol=2e-2, rtol=5e-2))
            err = float(jnp.max(jnp.abs(a - b)))
            assert ok, f"{tag}:{name} max|err|={err:.4g}"

    # 1) Resident fast path: whole bf16 adj^T cached once in VMEM.
    check("resident", N=16, v=1.0)
    # 2) Streaming (unrolled, 3 tiles, depth-2 prefetch) + multi-block head loop.
    check("streaming-unrolled", N=384, v=1.0, tile_rows=128, col_block=128)
    # 3) Streaming via lax.fori_loop path (forced by max_unrolled_tiles=1).
    check("streaming-fori", N=384, v=1.0, tile_rows=128, max_unrolled_tiles=1)
    # 4) Exercise the q ** ((v+1)/2) static branch (v != 1).
    check("pow-path", N=16, v=2.0)

    print("KERNEL_OK")
</pallas_src>

<mosaic_0001>
module attributes {stable_mosaic.version = 11 : i64} {
  func.func @_sdcn_kernel(%arg0: i32, %arg1: memref<32x128xbf16, #tpu.memory_space<vmem>>, %arg2: memref<128x128xbf16, #tpu.memory_space<any>>, %arg3: memref<64x32xbf16, #tpu.memory_space<vmem>>, %arg4: memref<32x64xbf16, #tpu.memory_space<vmem>>, %arg5: memref<16x32xbf16, #tpu.memory_space<vmem>>, %arg6: memref<8x16xbf16, #tpu.memory_space<vmem>>, %arg7: memref<508x8xbf16, #tpu.memory_space<vmem>>, %arg8: memref<500x1xf32, #tpu.memory_space<vmem>>, %arg9: memref<32x500xbf16, #tpu.memory_space<vmem>>, %arg10: memref<32x1xf32, #tpu.memory_space<vmem>>, %arg11: memref<4x8xf32, #tpu.memory_space<vmem>>, %arg12: memref<32x128xf32, #tpu.memory_space<vmem>>, %arg13: memref<4x128xf32, #tpu.memory_space<vmem>>, %arg14: memref<4x128xf32, #tpu.memory_space<vmem>>, %arg15: memref<128x128xbf16, #tpu.memory_space<vmem>>, %arg16: memref<1x!tpu.dma_semaphore, #tpu.memory_space<semaphore_mem>>, %arg17: memref<8x128xbf16, #tpu.memory_space<vmem>>, %arg18: memref<8x128xbf16, #tpu.memory_space<vmem>>, %arg19: memref<8x128xbf16, #tpu.memory_space<vmem>>) attributes {dimension_semantics = [#tpu.dimension_semantics<arbitrary>], iteration_bounds = array<i64: 1>, scalar_prefetch = 0 : i64, scratch_operands = 5 : i64, tpu.core_type = #tpu.core_type<tc>, window_params = [{pipeline_mode = #tpu.pipeline_mode<synchronous>, transform_indices = @transform_0, window_bounds = array<i64: 32, 128>}, {}, {pipeline_mode = #tpu.pipeline_mode<synchronous>, transform_indices = @transform_2, window_bounds = array<i64: 64, 32>}, {pipeline_mode = #tpu.pipeline_mode<synchronous>, transform_indices = @transform_3, window_bounds = array<i64: 32, 64>}, {pipeline_mode = #tpu.pipeline_mode<synchronous>, transform_indices = @transform_4, window_bounds = array<i64: 16, 32>}, {pipeline_mode = #tpu.pipeline_mode<synchronous>, transform_indices = @transform_5, window_bounds = array<i64: 8, 16>}, {pipeline_mode = #tpu.pipeline_mode<synchronous>, transform_indices = @transform_6, window_bounds = array<i64: 508, 8>}, {pipeline_mode = #tpu.pipeline_mode<synchronous>, transform_indices = @transform_7, window_bounds = array<i64: 500, 1>}, {pipeline_mode = #tpu.pipeline_mode<synchronous>, transform_indices = @transform_8, window_bounds = array<i64: 32, 500>}, {pipeline_mode = #tpu.pipeline_mode<synchronous>, transform_indices = @transform_9, window_bounds = array<i64: 32, 1>}, {pipeline_mode = #tpu.pipeline_mode<synchronous>, transform_indices = @transform_10, window_bounds = array<i64: 4, 8>}, {pipeline_mode = #tpu.pipeline_mode<synchronous>, transform_indices = @transform_11, window_bounds = array<i64: 32, 128>}, {pipeline_mode = #tpu.pipeline_mode<synchronous>, transform_indices = @transform_12, window_bounds = array<i64: 4, 128>}, {pipeline_mode = #tpu.pipeline_mode<synchronous>, transform_indices = @transform_13, window_bounds = array<i64: 4, 128>}]} {
    %c0_i32 = arith.constant 0 : i32
    %0 = tpu.memref_slice %arg16[%c0_i32] : memref<1x!tpu.dma_semaphore, #tpu.memory_space<semaphore_mem>> -> memref<1x!tpu.dma_semaphore, #tpu.memory_space<semaphore_mem>>
    %1 = tpu.memref_squeeze %0 : memref<1x!tpu.dma_semaphore, #tpu.memory_space<semaphore_mem>> -> memref<!tpu.dma_semaphore, #tpu.memory_space<semaphore_mem>>
    tpu.enqueue_dma source(%arg2 : memref<128x128xbf16, #tpu.memory_space<any>>) target(%arg15 : memref<128x128xbf16, #tpu.memory_space<vmem>>) target_semaphore(%1 : memref<!tpu.dma_semaphore, #tpu.memory_space<semaphore_mem>>)
    %c0 = arith.constant 0 : index
    %c0_0 = arith.constant 0 : index
    %2 = vector.load %arg1[%c0, %c0_0] : memref<32x128xbf16, #tpu.memory_space<vmem>>, vector<32x128xbf16>
    %c0_1 = arith.constant 0 : index
    %c0_2 = arith.constant 0 : index
    %3 = vector.load %arg3[%c0_1, %c0_2] : memref<64x32xbf16, #tpu.memory_space<vmem>>, vector<64x32xbf16>
    %cst = arith.constant dense<0.000000e+00> : vector<64x128xf32>
    %4 = tpu.matmul %3, %2, %cst {dimension_numbers = #tpu.dot_dimension_numbers<[1], [0], [0], [1], [0, 0, 1, 1], [], []>} : vector<64x32xbf16>, vector<32x128xbf16>, vector<64x128xf32> -> vector<64x128xf32>
    %5 = arith.truncf %4 : vector<64x128xf32> to vector<64x128xbf16>
    %c0_i32_3 = arith.constant 0 : i32
    %6 = tpu.memref_slice %arg16[%c0_i32_3] : memref<1x!tpu.dma_semaphore, #tpu.memory_space<semaphore_mem>> -> memref<1x!tpu.dma_semaphore, #tpu.memory_space<semaphore_mem>>
    %7 = tpu.memref_squeeze %6 : memref<1x!tpu.dma_semaphore, #tpu.memory_space<semaphore_mem>> -> memref<!tpu.dma_semaphore, #tpu.memory_space<semaphore_mem>>
    tpu.wait_dma2 semaphore(%7 : memref<!tpu.dma_semaphore, #tpu.memory_space<semaphore_mem>>) src(%arg2 : memref<128x128xbf16, #tpu.memory_space<any>>) dst(%arg15 : memref<128x128xbf16, #tpu.memory_space<vmem>>)
    %c0_4 = arith.constant 0 : index
    %c0_5 = arith.constant 0 : index
    %8 = vector.load %arg15[%c0_4, %c0_5] : memref<128x128xbf16, #tpu.memory_space<vmem>>, vector<128x128xbf16>
    %cst_6 = arith.constant dense<0.000000e+00> : vector<64x128xf32>
    %9 = tpu.matmul %5, %8, %cst_6 {dimension_numbers = #tpu.dot_dimension_numbers<[1], [0], [0], [1], [0, 0, 1, 1], [], []>} : vector<64x128xbf16>, vector<128x128xbf16>, vector<64x128xf32> -> vector<64x128xf32>
    %cst_7 = arith.constant 0.000000e+00 : f32
    %10 = vector.broadcast %cst_7 : f32 to vector<64x128xf32>
    %11 = arith.maximumf %9, %10 : vector<64x128xf32>
    %12 = arith.truncf %11 : vector<64x128xf32> to vector<64x128xbf16>
    %c0_8 = arith.constant 0 : index
    %c0_9 = arith.constant 0 : index
    %13 = vector.load %arg4[%c0_8, %c0_9] : memref<32x64xbf16, #tpu.memory_space<vmem>>, vector<32x64xbf16>
    %cst_10 = arith.constant dense<0.000000e+00> : vector<32x128xf32>
    %14 = tpu.matmul %13, %12, %cst_10 {dimension_numbers = #tpu.dot_dimension_numbers<[1], [0], [0], [1], [0, 0, 1, 1], [], []>} : vector<32x64xbf16>, vector<64x128xbf16>, vector<32x128xf32> -> vector<32x128xf32>
    %15 = arith.truncf %14 : vector<32x128xf32> to vector<32x128xbf16>
    %c0_11 = arith.constant 0 : index
    %c0_12 = arith.constant 0 : index
    %16 = vector.load %arg15[%c0_11, %c0_12] : memref<128x128xbf16, #tpu.memory_space<vmem>>, vector<128x128xbf16>
    %cst_13 = arith.constant dense<0.000000e+00> : vector<32x128xf32>
    %17 = tpu.matmul %15, %16, %cst_13 {dimension_numbers = #tpu.dot_dimension_numbers<[1], [0], [0], [1], [0, 0, 1, 1], [], []>} : vector<32x128xbf16>, vector<128x128xbf16>, vector<32x128xf32> -> vector<32x128xf32>
    %cst_14 = arith.constant 0.000000e+00 : f32
    %18 = vector.broadcast %cst_14 : f32 to vector<32x128xf32>
    %19 = arith.maximumf %17, %18 : vector<32x128xf32>
    %20 = arith.truncf %19 : vector<32x128xf32> to vector<32x128xbf16>
    %c0_15 = arith.constant 0 : index
    %c0_16 = arith.constant 0 : index
    %21 = vector.load %arg5[%c0_15, %c0_16] : memref<16x32xbf16, #tpu.memory_space<vmem>>, vector<16x32xbf16>
    %cst_17 = arith.constant dense<0.000000e+00> : vector<16x128xf32>
    %22 = tpu.matmul %21, %20, %cst_17 {dimension_numbers = #tpu.dot_dimension_numbers<[1], [0], [0], [1], [0, 0, 1, 1], [], []>} : vector<16x32xbf16>, vector<32x128xbf16>, vector<16x128xf32> -> vector<16x128xf32>
    %23 = arith.truncf %22 : vector<16x128xf32> to vector<16x128xbf16>
    %c0_18 = arith.constant 0 : index
    %c0_19 = arith.constant 0 : index
    %24 = vector.load %arg15[%c0_18, %c0_19] : memref<128x128xbf16, #tpu.memory_space<vmem>>, vector<128x128xbf16>
    %cst_20 = arith.constant dense<0.000000e+00> : vector<16x128xf32>
    %25 = tpu.matmul %23, %24, %cst_20 {dimension_numbers = #tpu.dot_dimension_numbers<[1], [0], [0], [1], [0, 0, 1, 1], [], []>} : vector<16x128xbf16>, vector<128x128xbf16>, vector<16x128xf32> -> vector<16x128xf32>
    %cst_21 = arith.constant 0.000000e+00 : f32
    %26 = vector.broadcast %cst_21 : f32 to vector<16x128xf32>
    %27 = arith.maximumf %25, %26 : vector<16x128xf32>
    %28 = arith.truncf %27 : vector<16x128xf32> to vector<16x128xbf16>
    %c0_22 = arith.constant 0 : index
    %c0_23 = arith.constant 0 : index
    %29 = vector.load %arg6[%c0_22, %c0_23] : memref<8x16xbf16, #tpu.memory_space<vmem>>, vector<8x16xbf16>
    %cst_24 = arith.constant dense<0.000000e+00> : vector<8x128xf32>
    %30 = tpu.matmul %29, %28, %cst_24 {dimension_numbers = #tpu.dot_dimension_numbers<[1], [0], [0], [1], [0, 0, 1, 1], [], []>} : vector<8x16xbf16>, vector<16x128xbf16>, vector<8x128xf32> -> vector<8x128xf32>
    %31 = arith.truncf %30 : vector<8x128xf32> to vector<8x128xbf16>
    %c0_25 = arith.constant 0 : index
    %c0_26 = arith.constant 0 : index
    %32 = vector.load %arg15[%c0_25, %c0_26] : memref<128x128xbf16, #tpu.memory_space<vmem>>, vector<128x128xbf16>
    %cst_27 = arith.constant dense<0.000000e+00> : vector<8x128xf32>
    %33 = tpu.matmul %31, %32, %cst_27 {dimension_numbers = #tpu.dot_dimension_numbers<[1], [0], [0], [1], [0, 0, 1, 1], [], []>} : vector<8x128xbf16>, vector<128x128xbf16>, vector<8x128xf32> -> vector<8x128xf32>
    %cst_28 = arith.constant 0.000000e+00 : f32
    %34 = vector.broadcast %cst_28 : f32 to vector<8x128xf32>
    %35 = arith.maximumf %33, %34 : vector<8x128xf32>
    %36 = arith.truncf %35 : vector<8x128xf32> to vector<8x128xbf16>
    %c0_29 = arith.constant 0 : index
    %c0_30 = arith.constant 0 : index
    %37 = vector.load %arg18[%c0_29, %c0_30] : memref<8x128xbf16, #tpu.memory_space<vmem>>, vector<8x128xbf16>
    tpu.vector_store %arg18[%c0_29, %c0_30], %36 {strides = array<i32>} : memref<8x128xbf16, #tpu.memory_space<vmem>>, vector<8x128xbf16>,
    %c0_31 = arith.constant 0 : index
    %c0_32 = arith.constant 0 : index
    %38 = vector.load %arg11[%c0_31, %c0_32] : memref<4x8xf32, #tpu.memory_space<vmem>>, vector<4x8xf32>
    %39 = arith.mulf %33, %33 : vector<8x128xf32>
    %cst_33 = arith.constant dense<0.000000e+00> : vector<128xf32>
    %40 = vector.multi_reduction <add>, %39, %cst_33 [0] : vector<8x128xf32> to vector<128xf32>
    %41 = vector.shape_cast %40 : vector<128xf32> to vector<1x128xf32>
    %42 = arith.mulf %38, %38 : vector<4x8xf32>
    %cst_34 = arith.constant dense<0.000000e+00> : vector<4xf32>
    %43 = vector.multi_reduction <add>, %42, %cst_34 [1] : vector<4x8xf32> to vector<4xf32>
    %44 = vector.shape_cast %43 : vector<4xf32> to vector<4x1xf32>
    %45 = arith.truncf %38 : vector<4x8xf32> to vector<4x8xbf16>
    %46 = arith.truncf %33 : vector<8x128xf32> to vector<8x128xbf16>
    %cst_35 = arith.constant dense<0.000000e+00> : vector<4x128xf32>
    %47 = tpu.matmul %45, %46, %cst_35 {dimension_numbers = #tpu.dot_dimension_numbers<[1], [0], [0], [1], [0, 0, 1, 1], [], []>} : vector<4x8xbf16>, vector<8x128xbf16>, vector<4x128xf32> -> vector<4x128xf32>
    %48 = vector.broadcast %41 : vector<1x128xf32> to vector<4x128xf32>
    %49 = vector.broadcast %44 : vector<4x1xf32> to vector<4x128xf32>
    %50 = arith.addf %48, %49 : vector<4x128xf32>
    %cst_36 = arith.constant 2.000000e+00 : f32
    %51 = vector.broadcast %cst_36 : f32 to vector<4x128xf32>
    %52 = arith.mulf %51, %47 : vector<4x128xf32>
    %53 = arith.subf %50, %52 : vector<4x128xf32>
    %cst_37 = arith.constant 0.000000e+00 : f32
    %54 = vector.broadcast %cst_37 : f32 to vector<4x128xf32>
    %55 = arith.maximumf %53, %54 : vector<4x128xf32>
    %cst_38 = arith.constant 1.000000e+00 : f32
    %56 = vector.broadcast %cst_38 : f32 to vector<4x128xf32>
    %57 = arith.mulf %55, %56 : vector<4x128xf32>
    %cst_39 = arith.constant 1.000000e+00 : f32
    %58 = vector.broadcast %cst_39 : f32 to vector<4x128xf32>
    %59 = arith.addf %58, %57 : vector<4x128xf32>
    %60 = tpu.reciprocal %59 {approx = true} : vector<4x128xf32> -> vector<4x128xf32>
    %cst_40 = arith.constant dense<0.000000e+00> : vector<128xf32>
    %61 = vector.multi_reduction <add>, %60, %cst_40 [0] : vector<4x128xf32> to vector<128xf32>
    %62 = vector.shape_cast %61 : vector<128xf32> to vector<1x128xf32>
    %63 = tpu.reciprocal %62 {approx = true} : vector<1x128xf32> -> vector<1x128xf32>
    %64 = vector.broadcast %63 : vector<1x128xf32> to vector<4x128xf32>
    %65 = arith.mulf %60, %64 : vector<4x128xf32>
    %c0_41 = arith.constant 0 : index
    %c0_42 = arith.constant 0 : index
    %66 = vector.load %arg13[%c0_41, %c0_42] : memref<4x128xf32, #tpu.memory_space<vmem>>, vector<4x128xf32>
    tpu.vector_store %arg13[%c0_41, %c0_42], %65 {strides = array<i32>} : memref<4x128xf32, #tpu.memory_space<vmem>>, vector<4x128xf32>,
    %c0_43 = arith.constant 0 : index
    %c0_44 = arith.constant 0 : index
    %67 = vector.load %arg7[%c0_43, %c0_44] : memref<508x8xbf16, #tpu.memory_space<vmem>>, vector<508x8xbf16>
    %c0_45 = arith.constant 0 : index
    %c0_46 = arith.constant 0 : index
    %68 = vector.load %arg8[%c0_45, %c0_46] : memref<500x1xf32, #tpu.memory_space<vmem>>, vector<500x1xf32>
    %c0_47 = arith.constant 0 : index
    %c0_48 = arith.constant 0 : index
    %69 = vector.load %arg9[%c0_47, %c0_48] : memref<32x500xbf16, #tpu.memory_space<vmem>>, vector<32x500xbf16>
    %c0_49 = arith.constant 0 : index
    %c0_50 = arith.constant 0 : index
    %70 = vector.load %arg10[%c0_49, %c0_50] : memref<32x1xf32, #tpu.memory_space<vmem>>, vector<32x1xf32>
    %c0_i32_51 = arith.constant 0 : i32
    %c1_i32 = arith.constant 1 : i32
    %71 = arith.muli %c0_i32_51, %c1_i32 : i32
    %c0_i32_52 = arith.constant 0 : i32
    %72 = arith.addi %c0_i32_52, %71 : i32
    %c128_i32 = arith.constant 128 : i32
    %73 = arith.muli %72, %c128_i32 : i32
    %74 = tpu.assume_multiple %73, 128 : i32
    %c0_53 = arith.constant 0 : index
    %75 = arith.index_cast %74 : i32 to index
    %76 = vector.load %arg18[%c0_53, %75] : memref<8x128xbf16, #tpu.memory_space<vmem>>, vector<8x128xbf16>
    %cst_54 = arith.constant dense<0.000000e+00> : vector<508x128xf32>
    %77 = tpu.matmul %67, %76, %cst_54 {dimension_numbers = #tpu.dot_dimension_numbers<[1], [0], [0], [1], [0, 0, 1, 1], [], []>} : vector<508x8xbf16>, vector<8x128xbf16>, vector<508x128xf32> -> vector<508x128xf32>
    %78 = vector.extract_strided_slice %77 {offsets = [0, 0], sizes = [8, 128], strides = [1, 1]} : vector<508x128xf32> to vector<8x128xf32>
    %79 = arith.truncf %78 : vector<8x128xf32> to vector<8x128xbf16>
    %c0_55 = arith.constant 0 : index
    %80 = arith.index_cast %74 : i32 to index
    %81 = vector.load %arg19[%c0_55, %80] : memref<8x128xbf16, #tpu.memory_space<vmem>>, vector<8x128xbf16>
    tpu.vector_store %arg19[%c0_55, %80], %79 {strides = array<i32>} : memref<8x128xbf16, #tpu.memory_space<vmem>>, vector<8x128xbf16>,
    %82 = vector.extract_strided_slice %77 {offsets = [8, 0], sizes = [500, 128], strides = [1, 1]} : vector<508x128xf32> to vector<500x128xf32>
    %83 = vector.broadcast %68 : vector<500x1xf32> to vector<500x128xf32>
    %84 = arith.addf %82, %83 : vector<500x128xf32>
    %cst_56 = arith.constant 0.000000e+00 : f32
    %85 = vector.broadcast %cst_56 : f32 to vector<500x128xf32>
    %86 = arith.maximumf %84, %85 : vector<500x128xf32>
    %87 = arith.truncf %86 : vector<500x128xf32> to vector<500x128xbf16>
    %cst_57 = arith.constant dense<0.000000e+00> : vector<32x128xf32>
    %88 = tpu.matmul %69, %87, %cst_57 {dimension_numbers = #tpu.dot_dimension_numbers<[1], [0], [0], [1], [0, 0, 1, 1], [], []>} : vector<32x500xbf16>, vector<500x128xbf16>, vector<32x128xf32> -> vector<32x128xf32>
    %89 = vector.broadcast %70 : vector<32x1xf32> to vector<32x128xf32>
    %90 = arith.addf %88, %89 : vector<32x128xf32>
    %cst_58 = arith.constant 0.000000e+00 : f32
    %91 = vector.broadcast %cst_58 : f32 to vector<32x128xf32>
    %92 = arith.maximumf %90, %91 : vector<32x128xf32>
    %c0_59 = arith.constant 0 : index
    %93 = arith.index_cast %74 : i32 to index
    %94 = vector.load %arg12[%c0_59, %93] : memref<32x128xf32, #tpu.memory_space<vmem>>, vector<32x128xf32>
    tpu.vector_store %arg12[%c0_59, %93], %92 {strides = array<i32>} : memref<32x128xf32, #tpu.memory_space<vmem>>, vector<32x128xf32>,
    %c1_i32_60 = arith.constant 1 : i32
    %c0_61 = arith.constant 0 : index
    %c0_62 = arith.constant 0 : index
    %95 = vector.load %arg19[%c0_61, %c0_62] : memref<8x128xbf16, #tpu.memory_space<vmem>>, vector<8x128xbf16>
    %c0_63 = arith.constant 0 : index
    %c0_64 = arith.constant 0 : index
    %96 = vector.load %arg15[%c0_63, %c0_64] : memref<128x128xbf16, #tpu.memory_space<vmem>>, vector<128x128xbf16>
    %cst_65 = arith.constant dense<0.000000e+00> : vector<8x128xf32>
    %97 = tpu.matmul %95, %96, %cst_65 {dimension_numbers = #tpu.dot_dimension_numbers<[1], [0], [0], [1], [0, 0, 1, 1], [], []>} : vector<8x128xbf16>, vector<128x128xbf16>, vector<8x128xf32> -> vector<8x128xf32>
    %98 = vector.extract_strided_slice %97 {offsets = [0, 0], sizes = [4, 128], strides = [1, 1]} : vector<8x128xf32> to vector<4x128xf32>
    %cst_66 = arith.constant dense<0xFF800000> : vector<128xf32>
    %99 = vector.multi_reduction <maximumf>, %98, %cst_66 [0] : vector<4x128xf32> to vector<128xf32>
    %100 = vector.shape_cast %99 : vector<128xf32> to vector<1x128xf32>
    %101 = vector.broadcast %100 : vector<1x128xf32> to vector<4x128xf32>
    %102 = arith.subf %98, %101 : vector<4x128xf32>
    %103 = math.exp %102 : vector<4x128xf32>
    %cst_67 = arith.constant dense<0.000000e+00> : vector<128xf32>
    %104 = vector.multi_reduction <add>, %103, %cst_67 [0] : vector<4x128xf32> to vector<128xf32>
    %105 = vector.shape_cast %104 : vector<128xf32> to vector<1x128xf32>
    %106 = tpu.reciprocal %105 {approx = true} : vector<1x128xf32> -> vector<1x128xf32>
    %107 = vector.broadcast %106 : vector<1x128xf32> to vector<4x128xf32>
    %108 = arith.mulf %103, %107 : vector<4x128xf32>
    %c0_68 = arith.constant 0 : index
    %c0_69 = arith.constant 0 : index
    %109 = vector.load %arg14[%c0_68, %c0_69] : memref<4x128xf32, #tpu.memory_space<vmem>>, vector<4x128xf32>
    tpu.vector_store %arg14[%c0_68, %c0_69], %108 {strides = array<i32>} : memref<4x128xf32, #tpu.memory_space<vmem>>, vector<4x128xf32>,
    return
  }
  func.func @transform_0(%arg0: i32) -> (i32, i32) {
    %c0_i32 = arith.constant 0 : i32
    %c0_i32_0 = arith.constant 0 : i32
    %c0_i32_1 = arith.constant 0 : i32
    return %c0_i32, %c0_i32_0 : i32, i32
  }
  func.func @transform_2(%arg0: i32) -> (i32, i32) {
    %c0_i32 = arith.constant 0 : i32
    %c0_i32_0 = arith.constant 0 : i32
    %c0_i32_1 = arith.constant 0 : i32
    return %c0_i32, %c0_i32_0 : i32, i32
  }
  func.func @transform_3(%arg0: i32) -> (i32, i32) {
    %c0_i32 = arith.constant 0 : i32
    %c0_i32_0 = arith.constant 0 : i32
    %c0_i32_1 = arith.constant 0 : i32
    return %c0_i32, %c0_i32_0 : i32, i32
  }
  func.func @transform_4(%arg0: i32) -> (i32, i32) {
    %c0_i32 = arith.constant 0 : i32
    %c0_i32_0 = arith.constant 0 : i32
    %c0_i32_1 = arith.constant 0 : i32
    return %c0_i32, %c0_i32_0 : i32, i32
  }
  func.func @transform_5(%arg0: i32) -> (i32, i32) {
    %c0_i32 = arith.constant 0 : i32
    %c0_i32_0 = arith.constant 0 : i32
    %c0_i32_1 = arith.constant 0 : i32
    return %c0_i32, %c0_i32_0 : i32, i32
  }
  func.func @transform_6(%arg0: i32) -> (i32, i32) {
    %c0_i32 = arith.constant 0 : i32
    %c0_i32_0 = arith.constant 0 : i32
    %c0_i32_1 = arith.constant 0 : i32
    return %c0_i32, %c0_i32_0 : i32, i32
  }
  func.func @transform_7(%arg0: i32) -> (i32, i32) {
    %c0_i32 = arith.constant 0 : i32
    %c0_i32_0 = arith.constant 0 : i32
    %c0_i32_1 = arith.constant 0 : i32
    return %c0_i32, %c0_i32_0 : i32, i32
  }
  func.func @transform_8(%arg0: i32) -> (i32, i32) {
    %c0_i32 = arith.constant 0 : i32
    %c0_i32_0 = arith.constant 0 : i32
    %c0_i32_1 = arith.constant 0 : i32
    return %c0_i32, %c0_i32_0 : i32, i32
  }
  func.func @transform_9(%arg0: i32) -> (i32, i32) {
    %c0_i32 = arith.constant 0 : i32
    %c0_i32_0 = arith.constant 0 : i32
    %c0_i32_1 = arith.constant 0 : i32
    return %c0_i32, %c0_i32_0 : i32, i32
  }
  func.func @transform_10(%arg0: i32) -> (i32, i32) {
    %c0_i32 = arith.constant 0 : i32
    %c0_i32_0 = arith.constant 0 : i32
    %c0_i32_1 = arith.constant 0 : i32
    return %c0_i32, %c0_i32_0 : i32, i32
  }
  func.func @transform_11(%arg0: i32) -> (i32, i32) {
    %c0_i32 = arith.constant 0 : i32
    %c0_i32_0 = arith.constant 0 : i32
    %c0_i32_1 = arith.constant 0 : i32
    return %c0_i32, %c0_i32_0 : i32, i32
  }
  func.func @transform_12(%arg0: i32) -> (i32, i32) {
    %c0_i32 = arith.constant 0 : i32
    %c0_i32_0 = arith.constant 0 : i32
    %c0_i32_1 = arith.constant 0 : i32
    return %c0_i32, %c0_i32_0 : i32, i32
  }
  func.func @transform_13(%arg0: i32) -> (i32, i32) {
    %c0_i32 = arith.constant 0 : i32
    %c0_i32_0 = arith.constant 0 : i32
    %c0_i32_1 = arith.constant 0 : i32
    return %c0_i32, %c0_i32_0 : i32, i32
  }
}

</mosaic_0001>

<bundles_post_ra>
// kernel: tpu_custom_call.1
= control target key start
LH: loop header
LB: loop body
LE: loop exit
PB: predicated region body
PF: predicated region fallthrough
CT: control target
= control target key end

     0   :  { %19 = vsyncpa [#allocation8], 0  ;;  %s3661_s0 = inlined_call_operand.vmem [shape: bf16[32,128], index: 0, kind: input, shape index: {}]   ;;  %s3662_s1 = inlined_call_operand.vmem [shape: bf16[128,128], index: 1, kind: input, shape index: {}]   ;;  %s3663_s2 = inlined_call_operand.vmem [shape: bf16[64,32], index: 2, kind: input, shape index: {}]   ;;  %s3664_s3 = inlined_call_operand.vmem [shape: bf16[32,64], index: 3, kind: input, shape index: {}]   ;;  %s3665_s4 = inlined_call_operand.vmem [shape: bf16[16,32], index: 4, kind: input, shape index: {}]   ;;  %s3666_s5 = inlined_call_operand.vmem [shape: bf16[8,16], index: 5, kind: input, shape index: {}]   ;;  %s3667_s6 = inlined_call_operand.vmem [shape: bf16[508,8], index: 6, kind: input, shape index: {}]   ;;  %s3668_s7 = inlined_call_operand.vmem [shape: f32[500,1], index: 7, kind: input, shape index: {}]   ;;  %s3669_s8 = inlined_call_operand.vmem [shape: bf16[32,500], index: 8, kind: input, shape index: {}]   ;;  %s3670_s9 = inlined_call_operand.vmem [shape: f32[32,1], index: 9, kind: input, shape index: {}]   ;;  %s3671_s10 = inlined_call_operand.vmem [shape: f32[4,8], index: 10, kind: input, shape index: {}]   ;;  %s3672_s11 = inlined_call_operand.hbm [shape: f32[32,128], index: 11, kind: output, shape index: {0}]   ;;  %s3673_s12 = inlined_call_operand.hbm [shape: f32[4,128], index: 12, kind: output, shape index: {1}]   ;;  %s3674_s13 = inlined_call_operand.hbm [shape: f32[4,128], index: 13, kind: output, shape index: {2}]  }
   0x1   :  { %20 = vsyncpa [#allocation10], 0  ;;  %v2858_v0 = vld [vmem:[%s3662_s1] sm:$0xff]  ;;  %v2863_v1 = vld [vmem:[%s3662_s1 + $0x8] sm:$0xff] }
   0x2   :  { %3685 = vst [vmem:[#allocation16_spill] sm:$0xff] %v2858_v0  ;;  %3686 = vst [vmem:[#allocation17_spill] sm:$0xff] %v2863_v1  ;;  %v2868_v2 = vld [vmem:[%s3662_s1 + $0x10] sm:$0xff]  ;;  %v2873_v3 = vld [vmem:[%s3662_s1 + $0x18] sm:$0xff] }
   0x3   :  { %3687 = vst [vmem:[#allocation18_spill] sm:$0xff] %v2868_v2  ;;  %3688 = vst [vmem:[#allocation19_spill] sm:$0xff] %v2873_v3  ;;  %v2878_v4 = vld [vmem:[%s3662_s1 + $0x20] sm:$0xff]  ;;  %v2883_v5 = vld [vmem:[%s3662_s1 + $0x28] sm:$0xff] }
   0x4   :  { %3689 = vst [vmem:[#allocation20_spill] sm:$0xff] %v2878_v4  ;;  %3690 = vst [vmem:[#allocation21_spill] sm:$0xff] %v2883_v5  ;;  %v2888_v6 = vld [vmem:[%s3662_s1 + $0x30] sm:$0xff]  ;;  %v2893_v7 = vld [vmem:[%s3662_s1 + $0x38] sm:$0xff] }
   0x5   :  { %3691 = vst [vmem:[#allocation22_spill] sm:$0xff] %v2888_v6  ;;  %3692 = vst [vmem:[#allocation23_spill] sm:$0xff] %v2893_v7 }
   0x6   :  { %97 = vsyncadd [#allocation3], 1024  ;;  %v2642_v8 = vld [vmem:[%s3661_s0] sm:$0xff]   ;;  %v2643_v9 = vld [vmem:[%s3661_s0 + $0x8] sm:$0xff]   ;;  %vm142_vm0 = vcmask 261120   ;;  %2430 = vmatprep.subr.bf16.mxu1 %v2858_v0 }
   0x7   :  { %2418 = vmatprep.subr.bf16.mxu0 %v2642_v8  ;;  %v2644_v10 = vld [vmem:[%s3663_s2] sm:$0xff]   ;;  %v2645_v11 = vld [vmem:[%s3663_s2 + $0x8] sm:$0xff]   ;;  %v2646_v12 = vld [vmem:[%s3663_s2 + $0x10] sm:$0xff]  }
   0x8   :  { %2419 = vmatpush3.bf16.msra.mxu0 %v2642_v8  ;;  %2422 = vmatprep.mubr.msk.bf16.mxu0 %vm142_vm0, %v2644_v10  ;;  %v2647_v13 = vld [vmem:[%s3663_s2 + $0x18] sm:$0xff]  }
   0x9   :  { %2420 = vmatprep.subr.bf16.mxu0 %v2643_v9 }
   0xc   :  { %2421 = vmatpush3.bf16.msra.mxu0 %v2643_v9 }
   0xf   :  { %2423 = vmatmul.mubr.msk.bf16.vlgmr.msra.gmra.mrb[0].mxu0 %vm142_vm0, %v2645_v11 }
  0x10   :  { %2426 = vmatprep.mubr.msk.bf16.mxu0 %vm142_vm0, %v2646_v12 }
  0x17   :  { %2427 = vmatmul.mubr.msk.bf16.gmra.mrb[4].mxu0 %vm142_vm0, %v2647_v13 }
  0xe2   :  { %v2424_v14 = vpop.f32.mrb[0].mxu0 }
  0xe3   :  { %v189_v15 = vpop.f32.mrb[1].mxu0 }
  0xe4   :  { %v2425_v16 = vpop.f32.mrb[2].mxu0 }
  0xe5   :  { %v221_v17 = vpack.c.bf16 %v2425_v16, %v2424_v14  ;;  %v192_v18 = vpop.f32.mrb[3].mxu0 }
  0xe6   :  { %v220_v19 = vpack.c.bf16 %v192_v18, %v189_v15 }
  0xe8   :  { %2446 = vmatprep.mubr.bf16.mxu1 %v220_v19 }
  0xea   :  { %v2428_v20 = vpop.f32.mrb[4].mxu0 }
  0xeb   :  { %v205_v21 = vpop.f32.mrb[5].mxu0 }
  0xec   :  { %v2429_v22 = vpop.f32.mrb[6].mxu0 }
  0xed   :  { %v223_v23 = vpack.c.bf16 %v2429_v22, %v2428_v20  ;;  %v208_v24 = vpop.f32.mrb[7].mxu0 }
  0xee   :  { %v222_v25 = vpack.c.bf16 %v208_v24, %v205_v21 }
  0xef   :  { %2771 = dma.done.wait [#allocation3], 1024 }
  0xf0   :  { %2772 = vsyncadd [#allocation3], 4294966272  ;;  %2431 = vmatpush3.bf16.msra.mxu1 %v2858_v0  ;;  %v2650_v26 = vld [vmem:[%s3664_s3] sm:$0xff]   ;;  %vm327_vm1 = vcmask 523264   ;;  %v2651_v47 = vld [vmem:[%s3664_s3 + $0x8] sm:$0xff]   ;;  %v3675_v54 = vmov 0.0  }
  0xf1   :  { %2432 = vmatprep.subr.bf16.mxu1 %v2863_v1  ;;  %2462 = vmatprep.mubr.msk.bf16.mxu0 %vm327_vm1, %v2650_v26  ;;  %vm2778_vm2 = vmmov 0   ;;  %v2652_v9 = vld [vmem:[%s3665_s4] sm:$0xff]   ;;  %v2779_v16 = vmov 0   ;;  %v787_v18 = vld [vmem:[%s3668_s7 + $0x98] sm:$0xff]  ;;  %v789_v20 = vld [vmem:[%s3668_s7 + $0xa8] sm:$0xff]  ;;  %vm537_vm3 = vcmask 130048  }
  0xf2   :  { %v768_v15 = vld [vmem:[%s3668_s7] sm:$0xff]  ;;  %2649 = vset.pattern.permute.xlu1 %v2779_v16  ;;  %2648 = vset.pattern.permute.xlu0 %v2779_v16  ;;  %v771_v19 = vld [vmem:[%s3668_s7 + $0x18] sm:$0xff]  ;;  %v773_v21 = vld [vmem:[%s3668_s7 + $0x28] sm:$0xff]  ;;  %vm634_vm4 = vcmask 60416   ;;  %vm644_vm5 = vcmask 1043456   ;;  %vm640_vm6 = vcmask 64512  }
  0xf3   :  { %1396 = vperm.xlu1 %2649, %v768_v15   ;;  %v791_v22 = vld [vmem:[%s3668_s7 + $0xb8] sm:$0xff]  ;;  %v793_v24 = vld [vmem:[%s3668_s7 + $0xc8] sm:$0xff]  ;;  %v792_v16 = vld [vmem:[%s3668_s7 + $0xc0] sm:$0xff]  ;;  %vm1925_vm7 = vcmask 949248   ;;  %vm1932_vm8 = vcmask 1041408  }
  0xf4   :  { %2433 = vmatpush3.bf16.msra.mxu1 %v2863_v1  ;;  %v795_v26 = vld [vmem:[%s3668_s7 + $0xd8] sm:$0xff] }
  0xf5   :  { %2434 = vmatprep.subr.bf16.mxu1 %v2868_v2 }
  0xf8   :  { %2435 = vmatpush3.bf16.msra.mxu1 %v2868_v2 }
  0xf9   :  { %2436 = vmatprep.subr.bf16.mxu1 %v2873_v3 }
  0xfc   :  { %2437 = vmatpush3.bf16.msra.mxu1 %v2873_v3 }
  0xfd   :  { %2438 = vmatprep.subr.bf16.mxu1 %v2878_v4 }
 0x100   :  { %2439 = vmatpush3.bf16.msra.mxu1 %v2878_v4 }
 0x101   :  { %2440 = vmatprep.subr.bf16.mxu1 %v2883_v5 }
 0x104   :  { %2441 = vmatpush3.bf16.msra.mxu1 %v2883_v5 }
 0x105   :  { %2442 = vmatprep.subr.bf16.mxu1 %v2888_v6 }
 0x108   :  { %2443 = vmatpush3.bf16.msra.mxu1 %v2888_v6 }
 0x109   :  { %2444 = vmatprep.subr.bf16.mxu1 %v2893_v7 }
 0x10c   :  { %2445 = vmatpush3.bf16.msra.mxu1 %v2893_v7 }
 0x10d   :  { %2494 = vmatprep.subr.bf16.mxu1 %v3675_v54 }
 0x10f   :  { %2447 = vmatmul.mubr.bf16.vlgmr.msra.gmra.mrb[0].mxu1 %v221_v17  ;;  %v769_v17 = vld [vmem:[%s3668_s7 + $0x8] sm:$0xff] }
 0x110   :  { %2450 = vmatprep.mubr.bf16.mxu1 %v222_v25  ;;  %2495 = vmatpush3.bf16.msra.mxu1 %v2858_v0  ;;  %v777_v25 = vld [vmem:[%s3668_s7 + $0x48] sm:$0xff] }
 0x111   :  { %2496 = vmatprep.subr.bf16.mxu1 %v3675_v54  ;;  %1401 = vperm.xlu1 %2649, %v769_v17   ;;  %v776_v17 = vld [vmem:[%s3668_s7 + $0x40] sm:$0xff] }
 0x114   :  { %2497 = vmatpush3.bf16.msra.mxu1 %v2863_v1 }
 0x115   :  { %2498 = vmatprep.subr.bf16.mxu1 %v3675_v54  ;;  %1491 = vperm.xlu1 %2649, %v787_v18   ;;  %v794_v18 = vld [vmem:[%s3668_s7 + $0xd0] sm:$0xff] }
 0x117   :  { %2451 = vmatmul.mubr.bf16.gmra.mrb[4].mxu1 %v223_v23  ;;  %v775_v23 = vld [vmem:[%s3668_s7 + $0x38] sm:$0xff] }
 0x118   :  { %2510 = vmatprep.mubr.msk.bf16.mxu1 %vm2778_vm2, %v3675_v54  ;;  %2499 = vmatpush3.bf16.msra.mxu1 %v2868_v2 }
 0x119   :  { %2500 = vmatprep.subr.bf16.mxu1 %v3675_v54  ;;  %1411 = vperm.xlu1 %2649, %v771_v19   ;;  %v778_v19 = vld [vmem:[%s3668_s7 + $0x50] sm:$0xff] }
 0x11c   :  { %2501 = vmatpush3.bf16.msra.mxu1 %v2873_v3 }
 0x11d   :  { %2502 = vmatprep.subr.bf16.mxu1 %v3675_v54  ;;  %1501 = vperm.xlu1 %2649, %v789_v20   ;;  %v796_v20 = vld [vmem:[%s3668_s7 + $0xe0] sm:$0xff] }
 0x120   :  { %2503 = vmatpush3.bf16.msra.mxu1 %v2878_v4 }
 0x121   :  { %2504 = vmatprep.subr.bf16.mxu1 %v3675_v54  ;;  %1421 = vperm.xlu1 %2649, %v773_v21   ;;  %v780_v21 = vld [vmem:[%s3668_s7 + $0x60] sm:$0xff] }
 0x124   :  { %2505 = vmatpush3.bf16.msra.mxu1 %v2883_v5 }
 0x125   :  { %2506 = vmatprep.subr.bf16.mxu1 %v3675_v54  ;;  %1511 = vperm.xlu1 %2649, %v791_v22   ;;  %v798_v22 = vld [vmem:[%s3668_s7 + $0xf0] sm:$0xff] }
 0x128   :  { %2507 = vmatpush3.bf16.msra.mxu1 %v2888_v6 }
 0x129   :  { %2508 = vmatprep.subr.bf16.mxu1 %v3675_v54  ;;  %1431 = vperm.xlu1 %2649, %v775_v23   ;;  %v782_v23 = vld [vmem:[%s3668_s7 + $0x70] sm:$0xff] }
 0x12c   :  { %2509 = vmatpush3.bf16.msra.mxu1 %v2893_v7 }
 0x12d   :  { %2540 = vmatprep.subr.bf16.mxu1 %v3675_v54  ;;  %1521 = vperm.xlu1 %2649, %v793_v24   ;;  %v816_v24 = vld [vmem:[%s3668_s7 + $0x180] sm:$0xff] }
 0x131   :  { %1441 = vperm.xlu1 %2649, %v777_v25   ;;  %v800_v25 = vld [vmem:[%s3668_s7 + $0x100] sm:$0xff] }
 0x135   :  { %1531 = vperm.xlu1 %2649, %v795_v26   ;;  %v818_v26 = vld [vmem:[%s3668_s7 + $0x190] sm:$0xff] }
 0x1e2   :  { %v2448_v27 = vpop.f32.mrb[0].mxu1 }
 0x1e3   :  { %v270_v28 = vpop.f32.mrb[1].mxu1  ;;  %v303_v30 = vmax.f32 %v2448_v27, 0.0  ;;  %v779_v27 = vld [vmem:[%s3668_s7 + $0x58] sm:$0xff] }
 0x1e4   :  { %v2449_v29 = vpop.f32.mrb[2].mxu1  ;;  %v301_v33 = vmax.f32 %v270_v28, 0.0  ;;  %1451 = vperm.xlu1 %2649, %v779_v27   ;;  %v797_v28 = vld [vmem:[%s3668_s7 + $0xe8] sm:$0xff]  ;;  %v802_v27 = vld [vmem:[%s3668_s7 + $0x110] sm:$0xff] }
 0x1e5   :  { %v304_v31 = vmax.f32 %v2449_v29, 0.0  ;;  %v273_v32 = vpop.f32.mrb[3].mxu1  ;;  %v781_v29 = vld [vmem:[%s3668_s7 + $0x68] sm:$0xff] }
 0x1e6   :  { %v302_v34 = vmax.f32 %v273_v32, 0.0  ;;  %v817_v32 = vld [vmem:[%s3668_s7 + $0x188] sm:$0xff] }
 0x1e7   :  { %v310_v35 = vpack.c.bf16 %v304_v31, %v303_v30  ;;  %v799_v30 = vld [vmem:[%s3668_s7 + $0xf8] sm:$0xff] }
 0x1e8   :  { %v309_v36 = vpack.c.bf16 %v302_v34, %v301_v33  ;;  %1541 = vperm.xlu1 %2649, %v797_v28   ;;  %v783_v31 = vld [vmem:[%s3668_s7 + $0x78] sm:$0xff]  ;;  %v801_v33 = vld [vmem:[%s3668_s7 + $0x108] sm:$0xff]  ;;  %v820_v28 = vld [vmem:[%s3668_s7 + $0x1a0] sm:$0xff] }
 0x1ea   :  { %v2452_v37 = vpop.f32.mrb[4].mxu1  ;;  %2454 = vmatprep.subr.bf16.mxu0 %v309_v36 }
 0x1eb   :  { %v286_v38 = vpop.f32.mrb[5].mxu1  ;;  %2455 = vmatpush3.bf16.msra.mxu0 %v309_v36  ;;  %v307_v40 = vmax.f32 %v2452_v37, 0.0 }
 0x1ec   :  { %v2453_v39 = vpop.f32.mrb[6].mxu1  ;;  %2456 = vmatprep.subr.bf16.mxu0 %v310_v35  ;;  %v305_v43 = vmax.f32 %v286_v38, 0.0  ;;  %1461 = vperm.xlu1 %2649, %v781_v29   ;;  %v804_v29 = vld [vmem:[%s3668_s7 + $0x120] sm:$0xff] }
 0x1ed   :  { %v308_v41 = vmax.f32 %v2453_v39, 0.0  ;;  %v289_v42 = vpop.f32.mrb[7].mxu1 }
 0x1ee   :  { %v306_v44 = vmax.f32 %v289_v42, 0.0  ;;  %v819_v42 = vld [vmem:[%s3668_s7 + $0x198] sm:$0xff] }
 0x1ef   :  { %v312_v45 = vpack.c.bf16 %v308_v41, %v307_v40  ;;  %2457 = vmatpush3.bf16.msra.mxu0 %v310_v35  ;;  %v536_v41 = vld [vmem:[%s3666_s5] sm:$0xf] }
 0x1f0   :  { %v311_v46 = vpack.c.bf16 %v306_v44, %v305_v43  ;;  %1551 = vperm.xlu1 %2649, %v799_v30   ;;  %v803_v43 = vld [vmem:[%s3668_s7 + $0x118] sm:$0xff]  ;;  %v821_v44 = vld [vmem:[%s3668_s7 + $0x1a8] sm:$0xff]  ;;  %v822_v30 = vld [vmem:[%s3668_s7 + $0x1b0] sm:$0xff] }
 0x1f2   :  { %2458 = vmatprep.subr.bf16.mxu0 %v311_v46 }
 0x1f3   :  { %2459 = vmatpush3.bf16.msra.mxu0 %v311_v46  ;;  %v805_v46 = vld [vmem:[%s3668_s7 + $0x128] sm:$0xff] }
 0x1f4   :  { %2460 = vmatprep.subr.bf16.mxu0 %v312_v45  ;;  %1471 = vperm.xlu1 %2649, %v783_v31   ;;  %v806_v31 = vld [vmem:[%s3668_s7 + $0x130] sm:$0xff] }
 0x1f7   :  { %2461 = vmatpush3.bf16.msra.mxu0 %v312_v45  ;;  %v784_v45 = vld [vmem:[%s3668_s7 + $0x80] sm:$0xff] }
 0x1f8   :  { %2466 = vmatprep.subr.bf16.mxu0 %v2858_v0  ;;  %1641 = vperm.xlu1 %2649, %v817_v32   ;;  %v824_v32 = vld [vmem:[%s3668_s7 + $0x1c0] sm:$0xff] }
 0x1f9   :  { %1476 = vperm.xlu0 %2648, %v784_v45  }
 0x1fa   :  { %2463 = vmatmul.mubr.msk.bf16.vlgmr.msra.gmra.mrb[8].mxu0 %vm327_vm1, %v2651_v47  ;;  %v785_v47 = vld [vmem:[%s3668_s7 + $0x88] sm:$0xff] }
 0x1fb   :  { %2467 = vmatpush3.bf16.msra.mxu0 %v2858_v0 }
 0x1fc   :  { %2468 = vmatprep.subr.bf16.mxu0 %v2863_v1  ;;  %1561 = vperm.xlu1 %2649, %v801_v33   ;;  %v808_v33 = vld [vmem:[%s3668_s7 + $0x140] sm:$0xff] }
 0x1fd   :  { %1481 = vperm.xlu0 %2648, %v785_v47  }
 0x1ff   :  { %2469 = vmatpush3.bf16.msra.mxu0 %v2863_v1 }
 0x200   :  { %2470 = vmatprep.subr.bf16.mxu0 %v2868_v2  ;;  %1651 = vperm.xlu1 %2649, %v819_v42   ;;  %v841_v42 = vld [vmem:[%s3670_s9 + $0x10] sm:$0xff] }
 0x203   :  { %2471 = vmatpush3.bf16.msra.mxu0 %v2868_v2 }
 0x204   :  { %2472 = vmatprep.subr.bf16.mxu0 %v2873_v3  ;;  %1571 = vperm.xlu1 %2649, %v803_v43   ;;  %v842_v43 = vld [vmem:[%s3670_s9 + $0x18] sm:$0xff] }
 0x207   :  { %2473 = vmatpush3.bf16.msra.mxu0 %v2873_v3 }
 0x208   :  { %2474 = vmatprep.subr.bf16.mxu0 %v2878_v4  ;;  %1661 = vperm.xlu1 %2649, %v821_v44  }
 0x20b   :  { %2475 = vmatpush3.bf16.msra.mxu0 %v2878_v4 }
 0x20c   :  { %2476 = vmatprep.subr.bf16.mxu0 %v2883_v5  ;;  %1581 = vperm.xlu1 %2649, %v805_v46  }
 0x20f   :  { %2477 = vmatpush3.bf16.msra.mxu0 %v2883_v5 }
 0x210   :  { %2478 = vmatprep.subr.bf16.mxu0 %v2888_v6 }
 0x213   :  { %2479 = vmatpush3.bf16.msra.mxu0 %v2888_v6 }
 0x214   :  { %2480 = vmatprep.subr.bf16.mxu0 %v2893_v7 }
 0x217   :  { %2481 = vmatpush3.bf16.msra.mxu0 %v2893_v7 }
 0x218   :  { %2486 = vmatprep.subr.bf16.mxu0 %v3675_v54 }
 0x2cd   :  { %v2464_v48 = vpop.f32.mrb[8].mxu0 }
 0x2ce   :  { %v368_v49 = vpop.f32.mrb[9].mxu0 }
 0x2cf   :  { %v2465_v50 = vpop.f32.mrb[10].mxu0 }
 0x2d0   :  { %v384_v51 = vpack.c.bf16 %v2465_v50, %v2464_v48  ;;  %v371_v52 = vpop.f32.mrb[11].mxu0  ;;  %v823_v48 = vld [vmem:[%s3668_s7 + $0x1b8] sm:$0xff] }
 0x2d1   :  { %v383_v53 = vpack.c.bf16 %v371_v52, %v368_v49  ;;  %v786_v49 = vld [vmem:[%s3668_s7 + $0x90] sm:$0xff]  ;;  %1671 = vperm.xlu1 %2649, %v823_v48   ;;  %v807_v50 = vld [vmem:[%s3668_s7 + $0x138] sm:$0xff]  ;;  %v825_v52 = vld [vmem:[%s3668_s7 + $0x1c8] sm:$0xff] }
 0x2d2   :  { %1486 = vperm.xlu0 %2648, %v786_v49  }
 0x2d3   :  { %2482 = vmatprep.mubr.bf16.mxu0 %v383_v53  ;;  %v788_v53 = vld [vmem:[%s3668_s7 + $0xa0] sm:$0xff] }
 0x2d4   :  { %2483 = vmatmul.mubr.bf16.vlgmr.msra.gmra.mrb[12].mxu0 %v384_v51  ;;  %v770_v51 = vld [vmem:[%s3668_s7 + $0x10] sm:$0xff] }
 0x2d5   :  { %2490 = vmatprep.mubr.msk.bf16.mxu0 %vm2778_vm2, %v3675_v54  ;;  %1591 = vperm.xlu1 %2649, %v807_v50  }
 0x2d6   :  { %1406 = vperm.xlu0 %2648, %v770_v51  }
 0x2d9   :  { %1681 = vperm.xlu1 %2649, %v825_v52  }
 0x2da   :  { %1496 = vperm.xlu0 %2648, %v788_v53   ;;  %v2653_v53 = vld [vmem:[%s3667_s6] sm:$0xff]  }
 0x3a7   :  { %v2484_v55 = vpop.f32.mrb[12].mxu0 }
 0x3a8   :  { %v419_v56 = vpop.f32.mrb[13].mxu0  ;;  %v436_v58 = vmax.f32 %v2484_v55, 0.0  ;;  %v809_v55 = vld [vmem:[%s3668_s7 + $0x148] sm:$0xff] }
 0x3a9   :  { %v2485_v57 = vpop.f32.mrb[14].mxu0  ;;  %v434_v61 = vmax.f32 %v419_v56, 0.0  ;;  %v772_v56 = vld [vmem:[%s3668_s7 + $0x20] sm:$0xff]  ;;  %1601 = vperm.xlu1 %2649, %v809_v55  }
 0x3aa   :  { %v437_v59 = vmax.f32 %v2485_v57, 0.0  ;;  %v422_v60 = vpop.f32.mrb[15].mxu0  ;;  %1416 = vperm.xlu0 %2648, %v772_v56   ;;  %v827_v57 = vld [vmem:[%s3668_s7 + $0x1d8] sm:$0xff] }
 0x3ab   :  { %v435_v62 = vmax.f32 %v422_v60, 0.0  ;;  %v774_v60 = vld [vmem:[%s3668_s7 + $0x30] sm:$0xff] }
 0x3ac   :  { %v439_v63 = vpack.c.bf16 %v437_v59, %v436_v58  ;;  %v790_v58 = vld [vmem:[%s3668_s7 + $0xb0] sm:$0xff]  ;;  %v811_v59 = vld [vmem:[%s3668_s7 + $0x158] sm:$0xff] }
 0x3ad   :  { %v438_v8 = vpack.c.bf16 %v435_v62, %v434_v61  ;;  %1691 = vperm.xlu1 %2649, %v827_v57   ;;  %v829_v61 = vld [vmem:[%s3668_s7 + $0x1e8] sm:$0xff] }
 0x3ae   :  { %1506 = vperm.xlu0 %2648, %v790_v58   ;;  %v813_v62 = vld [vmem:[%s3668_s7 + $0x168] sm:$0xff]  ;;  %v2655_v58 = vld [vmem:[%s3667_s6 + $0x10] sm:$0xff]  }
 0x3af   :  { %2487 = vmatpush3.bf16.msra.mxu0 %v438_v8  ;;  %v3130_v8 = vld [vmem:[%s3671_s10] sm:$0xf]  ;;  %v2654_v57 = vld [vmem:[%s3667_s6 + $0x8] sm:$0xff]  }
 0x3b0   :  { %2488 = vmatprep.subr.bf16.mxu0 %v3675_v54  ;;  %v638_v49 = vpack.c.bf16 %v3130_v8, %v3130_v8 }
 0x3b1   :  { %1611 = vperm.xlu1 %2649, %v811_v59   ;;  %v2656_v59 = vld [vmem:[%s3667_s6 + $0x18] sm:$0xff]  }
 0x3b2   :  { %1426 = vperm.xlu0 %2648, %v774_v60   ;;  %v2657_v60 = vld [vmem:[%s3667_s6 + $0x20] sm:$0xff]  }
 0x3b3   :  { %2489 = vmatpush3.bf16.msra.mxu0 %v439_v63  ;;  %v814_v63 = vld [vmem:[%s3668_s7 + $0x170] sm:$0xff] }
 0x3b4   :  { %2514 = vmatprep.subr.bf16.mxu0 %v3675_v54 }
 0x3b5   :  { %1701 = vperm.xlu1 %2649, %v829_v61   ;;  %v2658_v61 = vld [vmem:[%s3667_s6 + $0x28] sm:$0xff]  }
 0x3b6   :  { %2491 = vmatmul.mubr.msk.bf16.vlgmr.msra.gmra.mrb[16].mxu0 %vm142_vm0, %v2652_v9  ;;  %v633_v9 = vmul.f32 %v3130_v8, %v3130_v8  ;;  %1516 = vperm.xlu0 %2648, %v792_v16  }
 0x3b7   :  { %2516 = vmatprep.mubr.msk.bf16.mxu0 %vm2778_vm2, %v3675_v54 }
 0x3b9   :  { %1621 = vperm.xlu1 %2649, %v813_v62   ;;  %v3252_v62 = vpop.permute.xlu1 %1396 }
 0x3ba   :  { %1436 = vperm.xlu0 %2648, %v776_v17   ;;  %v2665_v17 = vld [vmem:[%s3667_s6 + $0x60] sm:$0xff]  }
 0x3bd   :  { %1626 = vperm.xlu1 %2649, %v814_v63   ;;  %v2659_v63 = vld [vmem:[%s3667_s6 + $0x30] sm:$0xff]   ;;  %v3259_v8 = vpop.permute.xlu1 %1401 }
 0x3be   :  { %1526 = vperm.xlu0 %2648, %v794_v18  }
 0x3c2   :  { %1446 = vperm.xlu0 %2648, %v778_v19   ;;  %v2666_v19 = vld [vmem:[%s3667_s6 + $0x68] sm:$0xff]  }
 0x3c6   :  { %1536 = vperm.xlu0 %2648, %v796_v20   ;;  %v2667_v20 = vld [vmem:[%s3667_s6 + $0x70] sm:$0xff]  }
 0x3ca   :  { %1456 = vperm.xlu0 %2648, %v780_v21  }
 0x3ce   :  { %1546 = vperm.xlu0 %2648, %v798_v22   ;;  %v2668_v22 = vld [vmem:[%s3667_s6 + $0x78] sm:$0xff]  }
 0x3d2   :  { %1466 = vperm.xlu0 %2648, %v782_v23   ;;  %v2669_v23 = vld [vmem:[%s3667_s6 + $0x80] sm:$0xff]  }
 0x3d6   :  { %1636 = vperm.xlu0 %2648, %v816_v24  }
 0x3da   :  { %1556 = vperm.xlu0 %2648, %v800_v25   ;;  %v2670_v25 = vld [vmem:[%s3667_s6 + $0x88] sm:$0xff]  }
 0x3de   :  { %1646 = vperm.xlu0 %2648, %v818_v26  }
 0x3e2   :  { %1566 = vperm.xlu0 %2648, %v802_v27   ;;  %v2671_v27 = vld [vmem:[%s3667_s6 + $0x90] sm:$0xff]  }
 0x3e6   :  { %1656 = vperm.xlu0 %2648, %v820_v28  }
 0x3ea   :  { %1576 = vperm.xlu0 %2648, %v804_v29   ;;  %v2672_v29 = vld [vmem:[%s3667_s6 + $0x98] sm:$0xff]  }
 0x3ee   :  { %1666 = vperm.xlu0 %2648, %v822_v30   ;;  %v2673_v30 = vld [vmem:[%s3667_s6 + $0xa0] sm:$0xff]  }
 0x3f2   :  { %1586 = vperm.xlu0 %2648, %v806_v31  }
 0x3f6   :  { %1676 = vperm.xlu0 %2648, %v824_v32   ;;  %v2674_v32 = vld [vmem:[%s3667_s6 + $0xa8] sm:$0xff]  }
 0x3fa   :  { %1596 = vperm.xlu0 %2648, %v808_v33   ;;  %v2675_v33 = vld [vmem:[%s3667_s6 + $0xb0] sm:$0xff]  }
 0x489   :  { %v484_v10 = vpop.f32.mrb[16].mxu0 }
 0x48a   :  { %v2492_v11 = vpop.f32.mrb[17].mxu0 }
 0x48b   :  { %v487_v12 = vpop.f32.mrb[18].mxu0 }
 0x48c   :  { %v491_v13 = vpack.c.bf16 %v487_v12, %v484_v10  ;;  %v2493_v14 = vpop.f32.mrb[19].mxu0  ;;  %v635_v10 = vsel %vm634_vm4, %v633_v9, 0.0  ;;  %v2660_v9 = vld [vmem:[%s3667_s6 + $0x38] sm:$0xff]  }
 0x48d   :  { %636 = vadd.xlane.f32.xlu1 %v635_v10  ;;  %v2661_v10 = vld [vmem:[%s3667_s6 + $0x40] sm:$0xff]  }
 0x48e   :  { %2511 = vmatmul.mubr.bf16.vlgmr.msra.gmra.mrb[8].mxu1 %v491_v13 }
 0x48f   :  { %2542 = vmatprep.mubr.msk.bf16.mxu1 %vm2778_vm2, %v3675_v54 }
 0x561   :  { %v526_v34 = vpop.f32.mrb[8].mxu1 }
 0x562   :  { %v2512_v35 = vpop.f32.mrb[9].mxu1  ;;  %v533_v37 = vmax.f32 %v526_v34, 0.0  ;;  %v826_v34 = vld [vmem:[%s3668_s7 + $0x1d0] sm:$0xff] }
 0x563   :  { %v529_v36 = vpop.f32.mrb[10].mxu1  ;;  %1686 = vperm.xlu0 %2648, %v826_v34   ;;  %v810_v35 = vld [vmem:[%s3668_s7 + $0x150] sm:$0xff] }
 0x564   :  { %v534_v38 = vmax.f32 %v529_v36, 0.0  ;;  %v2513_v39 = vpop.f32.mrb[11].mxu1  ;;  %v828_v36 = vld [vmem:[%s3668_s7 + $0x1e0] sm:$0xff] }
 0x565   :  { %v815_v39 = vld [vmem:[%s3668_s7 + $0x178] sm:$0xff] }
 0x566   :  { %v535_v40 = vpack.c.bf16 %v534_v38, %v533_v37  ;;  %v812_v37 = vld [vmem:[%s3668_s7 + $0x160] sm:$0xff]  ;;  %v830_v38 = vld [vmem:[%s3668_s7 + $0x1f0] sm:$0xf] }
 0x567   :  { %1606 = vperm.xlu0 %2648, %v810_v35   ;;  %v2676_v35 = vld [vmem:[%s3667_s6 + $0xb8] sm:$0xff]  }
 0x568   :  { %2515 = vmatpush3.bf16.msra.mxu0 %v535_v40  ;;  %v839_v40 = vld [vmem:[%s3670_s9] sm:$0xff] }
 0x569   :  { %2520 = vmatprep.subr.bf16.mxu0 %v3675_v54 }
 0x56b   :  { %2517 = vmatmul.mubr.msk.bf16.vlgmr.msra.gmra.mrb[20].mxu0 %vm537_vm3, %v536_v41  ;;  %1696 = vperm.xlu0 %2648, %v828_v36   ;;  %v840_v41 = vld [vmem:[%s3670_s9 + $0x8] sm:$0xff] }
 0x56c   :  { %2521 = vmatpush3.bf16.msra.mxu0 %v2858_v0  ;;  %2536 = vmatprep.mubr.msk.bf16.mxu0 %vm2778_vm2, %v3675_v54 }
 0x56d   :  { %2522 = vmatprep.subr.bf16.mxu0 %v3675_v54 }
 0x56f   :  { %1616 = vperm.xlu0 %2648, %v812_v37   ;;  %v2677_v37 = vld [vmem:[%s3667_s6 + $0xc0] sm:$0xff]  }
 0x570   :  { %2523 = vmatpush3.bf16.msra.mxu0 %v2863_v1 }
 0x571   :  { %2524 = vmatprep.subr.bf16.mxu0 %v3675_v54 }
 0x573   :  { %1706 = vperm.xlu0 %2648, %v830_v38  }
 0x574   :  { %2525 = vmatpush3.bf16.msra.mxu0 %v2868_v2 }
 0x575   :  { %2526 = vmatprep.subr.bf16.mxu0 %v3675_v54 }
 0x577   :  { %1631 = vperm.xlu0 %2648, %v815_v39   ;;  %v2678_v39 = vld [vmem:[%s3667_s6 + $0xc8] sm:$0xff]  }
 0x578   :  { %2527 = vmatpush3.bf16.msra.mxu0 %v2873_v3 }
 0x579   :  { %2528 = vmatprep.subr.bf16.mxu0 %v3675_v54 }
 0x57b   :  { %1869 = vperm.xlu0 %2648, %v839_v40   ;;  %v2679_v40 = vld [vmem:[%s3667_s6 + $0xd0] sm:$0xff]  }
 0x57c   :  { %2529 = vmatpush3.bf16.msra.mxu0 %v2878_v4 }
 0x57d   :  { %2530 = vmatprep.subr.bf16.mxu0 %v3675_v54 }
 0x57f   :  { %1874 = vperm.xlu0 %2648, %v840_v41  }
 0x580   :  { %2531 = vmatpush3.bf16.msra.mxu0 %v2883_v5 }
 0x581   :  { %2532 = vmatprep.subr.bf16.mxu0 %v3675_v54 }
 0x583   :  { %1879 = vperm.xlu0 %2648, %v841_v42   ;;  %v2680_v42 = vld [vmem:[%s3667_s6 + $0xd8] sm:$0xff]  }
 0x584   :  { %2533 = vmatpush3.bf16.msra.mxu0 %v2888_v6 }
 0x585   :  { %2534 = vmatprep.subr.bf16.mxu0 %v3675_v54 }
 0x587   :  { %1884 = vperm.xlu0 %2648, %v842_v43   ;;  %v2681_v43 = vld [vmem:[%s3667_s6 + $0xe0] sm:$0xff]  }
 0x588   :  { %2535 = vmatpush3.bf16.msra.mxu0 %v2893_v7 }
 0x63e   :  { %v575_v11 = vpop.f32.mrb[20].mxu0 }
 0x63f   :  { %v581_v12 = vpack.c.bf16 %v575_v11, %v575_v11  ;;  %v2518_v13 = vpop.f32.mrb[21].mxu0  ;;  %v3268_v11 = vpop.permute.xlu1 %1491 }
 0x640   :  { %v578_v14 = vpop.f32.mrb[22].mxu0  ;;  %v2663_v13 = vld [vmem:[%s3667_s6 + $0x50] sm:$0xff]  }
 0x641   :  { %v2519_v15 = vpop.f32.mrb[23].mxu0  ;;  %2537 = vmatmul.mubr.bf16.vlgmr.msra.gmra.mrb[24].mxu0 %v581_v12  ;;  %v2662_v12 = vld [vmem:[%s3667_s6 + $0x48] sm:$0xff]  }
 0x642   :  { %v2664_v15 = vld [vmem:[%s3667_s6 + $0x58] sm:$0xff]  }
 0x643   :  { %v3277_v14 = vpop.permute.xlu1 %1411 }
 0x647   :  { %v3284_v16 = vpop.permute.xlu1 %1501 }
 0x64b   :  { %v3291_v18 = vpop.permute.xlu1 %1421 }
 0x64f   :  { %v3300_v21 = vpop.permute.xlu1 %1511 }
 0x653   :  { %v3309_v24 = vpop.permute.xlu1 %1431 }
 0x657   :  { %v3316_v26 = vpop.permute.xlu1 %1521 }
 0x65b   :  { %v3323_v28 = vpop.permute.xlu1 %1441 }
 0x65f   :  { %v3332_v31 = vpop.permute.xlu1 %1531 }
 0x663   :  { %v3341_v34 = vpop.permute.xlu1 %1451 }
 0x667   :  { %v3348_v36 = vpop.permute.xlu1 %1541 }
 0x66b   :  { %v3355_v38 = vpop.permute.xlu1 %1461 }
 0x66f   :  { %v3364_v41 = vpop.permute.xlu1 %1551 }
 0x714   :  { %v3218_v44 = vpop.f32.mrb[24].mxu0 }
 0x715   :  { %v622_v45 = vmax.f32 %v3218_v44, 0.0  ;;  %v639_v46 = vpack.c.bf16 %v3218_v44, %v3218_v44  ;;  %v2538_v47 = vpop.f32.mrb[25].mxu0 }
 0x716   :  { %v619_v48 = vpop.f32.mrb[26].mxu0 }
 0x717   :  { %v623_v50 = vpack.c.bf16 %v622_v45, %v622_v45  ;;  %v2539_v51 = vpop.f32.mrb[27].mxu0  ;;  %v646_v52 = vsel %vm644_vm5, %v639_v46, 0  ;;  %v3373_v45 = vpop.permute.xlu1 %1471  ;;  %v2682_v46 = vld [vmem:[%s3667_s6 + $0xe8] sm:$0xff]   ;;  %v2683_v48 = vld [vmem:[%s3667_s6 + $0xf0] sm:$0xff]  }
 0x718   :  { %2541 = vmatpush3.bf16.msra.mxu1 %v646_v52  ;;  %v3395_v52 = vpop.permute.xlu0 %1476 }
 0x719   :  { %624 = vst [vmem:[#allocation5] sm:$0xf] %v623_v50  ;;  %v2684_v50 = vld [vmem:[%s3667_s6 + $0xf8] sm:$0x3f]  }
 0x71b   :  { %2543 = vmatmul.mubr.msk.bf16.vlgmr.msra.gmra.mrb[12].mxu1 %vm640_vm6, %v638_v49  ;;  %v3380_v47 = vpop.permute.xlu1 %1641 }
 0x71c   :  { %2548 = vmatprep.mubr.msk.bf16.mxu1 %vm640_vm6, %v2653_v53 }
 0x71f   :  { %v3387_v49 = vpop.permute.xlu1 %1561 }
 0x720   :  { %v843_v55 = vld [vmem:[#allocation5] sm:$0xf] }
 0x721   :  { %2632 = vmatprep.subr.msk.bf16.mxu1 %vm644_vm5, %v843_v55  ;;  %v1101_v56 = vsel %vm644_vm5, %v843_v55, 0  ;;  %v3399_v55 = vpop.permute.xlu0 %1481 }
 0x722   :  { %2547 = vmatpush3.bf16.msra.mxu1 %v1101_v56 }
 0x723   :  { %v3393_v51 = vpop.permute.xlu1 %1651 }
 0x725   :  { %2549 = vmatmul.mubr.msk.bf16.vlgmr.msra.gmra.mrb[16].mxu1 %vm640_vm6, %v2654_v57  ;;  %v3403_v57 = vpop.permute.xlu0 %1486 }
 0x726   :  { %2552 = vmatprep.mubr.msk.bf16.mxu1 %vm640_vm6, %v2655_v58 }
 0x727   :  { %v3397_v53 = vpop.permute.xlu1 %1571 }
 0x72b   :  { %v3401_v56 = vpop.permute.xlu1 %1661 }
 0x72d   :  { %2553 = vmatmul.mubr.msk.bf16.gmra.mrb[20].mxu1 %vm640_vm6, %v2656_v59  ;;  %v1407_v59 = vpop.permute.xlu0 %1406 }
 0x72e   :  { %2556 = vmatprep.mubr.msk.bf16.mxu1 %vm640_vm6, %v2657_v60 }
 0x72f   :  { %v3405_v58 = vpop.permute.xlu1 %1581 }
 0x733   :  { %v3407_v60 = vpop.permute.xlu1 %1671 }
 0x734   :  { %3693 = vst [vmem:[#allocation24_spill] sm:$0xff] %v3407_v60 }
 0x735   :  { %2557 = vmatmul.mubr.msk.bf16.gmra.mrb[24].mxu1 %vm640_vm6, %v2658_v61  ;;  %v3409_v61 = vpop.permute.xlu0 %1496 }
 0x736   :  { %2560 = vmatprep.mubr.msk.bf16.mxu1 %vm640_vm6, %v2659_v63 }
 0x737   :  { %v3411_v63 = vpop.permute.xlu1 %1591 }
 0x73d   :  { %2561 = vmatmul.mubr.msk.bf16.gmra.mrb[28].mxu1 %vm640_vm6, %v2660_v9  ;;  %v1417_v9 = vpop.permute.xlu0 %1416 }
 0x73e   :  { %2564 = vmatprep.mubr.msk.bf16.mxu1 %vm640_vm6, %v2661_v10  ;;  %v2687_v10 = vld [vmem:[%s3669_s8 + $0x4] ss:$16 sps:$4 sm:$0xff]  }
 0x73f   :  { %1968 = vmatprep.mubr.bf16.mxu0 %v2687_v10 }
 0x745   :  { %2565 = vmatmul.mubr.msk.bf16.gmra.mrb[32].mxu1 %vm640_vm6, %v2662_v12  ;;  %v3416_v12 = vpop.permute.xlu1 %1681 }
 0x746   :  { %2568 = vmatprep.mubr.msk.bf16.mxu1 %vm640_vm6, %v2663_v13  ;;  %v3418_v13 = vpop.permute.xlu0 %1506 }
 0x74d   :  { %2569 = vmatmul.mubr.msk.bf16.gmra.mrb[36].mxu1 %vm640_vm6, %v2664_v15  ;;  %v3420_v15 = vpop.permute.xlu1 %1601 }
 0x74e   :  { %2572 = vmatprep.mubr.msk.bf16.mxu1 %vm640_vm6, %v2665_v17  ;;  %v3422_v17 = vpop.permute.xlu0 %1426 }
 0x755   :  { %2573 = vmatmul.mubr.msk.bf16.gmra.mrb[40].mxu1 %vm640_vm6, %v2666_v19  ;;  %v3424_v19 = vpop.permute.xlu1 %1691 }
 0x756   :  { %2576 = vmatprep.mubr.msk.bf16.mxu1 %vm640_vm6, %v2667_v20  ;;  %3694 = vst [vmem:[#allocation25_spill] sm:$0xff] %v3424_v19  ;;  %v3426_v20 = vpop.permute.xlu0 %1516 }
 0x75d   :  { %2577 = vmatmul.mubr.msk.bf16.gmra.mrb[44].mxu1 %vm640_vm6, %v2668_v22  ;;  %v626_v22 = vmul.f32 %v3218_v44, %v3218_v44 }
 0x75e   :  { %2580 = vmatprep.mubr.msk.bf16.mxu1 %vm640_vm6, %v2669_v23  ;;  %v3430_v23 = vpop.permute.xlu1 %1611 }
 0x765   :  { %2581 = vmatmul.mubr.msk.bf16.gmra.mrb[48].mxu1 %vm640_vm6, %v2670_v25  ;;  %v3432_v25 = vpop.permute.xlu0 %1436 }
 0x766   :  { %2584 = vmatprep.mubr.msk.bf16.mxu1 %vm640_vm6, %v2671_v27  ;;  %v627_v27 = vrot.slane %v626_v22, 4 }
 0x76d   :  { %2585 = vmatmul.mubr.msk.bf16.gmra.mrb[52].mxu1 %vm640_vm6, %v2672_v29  ;;  %v3434_v29 = vpop.permute.xlu1 %1701 }
 0x76e   :  { %2588 = vmatprep.mubr.msk.bf16.mxu1 %vm640_vm6, %v2673_v30  ;;  %3695 = vst [vmem:[#allocation26_spill] sm:$0xff] %v3434_v29  ;;  %v628_v30 = vadd.f32 %v627_v27, %v626_v22 }
 0x775   :  { %2589 = vmatmul.mubr.msk.bf16.gmra.mrb[56].mxu1 %vm640_vm6, %v2674_v32  ;;  %v3436_v32 = vpop.permute.xlu0 %1526 }
 0x776   :  { %2592 = vmatprep.mubr.msk.bf16.mxu1 %vm640_vm6, %v2675_v33  ;;  %v629_v33 = vrot.slane %v628_v30, 2 }
 0x77d   :  { %2593 = vmatmul.mubr.msk.bf16.gmra.mrb[60].mxu1 %vm640_vm6, %v2676_v35  ;;  %v3438_v35 = vpop.permute.xlu1 %1621 }
 0x77e   :  { %2596 = vmatprep.mubr.msk.bf16.mxu1 %vm640_vm6, %v2677_v37  ;;  %v3440_v37 = vpop.permute.xlu0 %1446 }
 0x782   :  { %v3444_v44 = vpop.permute.xlu0 %1536 }
 0x785   :  { %2597 = vmatmul.mubr.msk.bf16.gmra.mrb[64].mxu1 %vm640_vm6, %v2678_v39  ;;  %v630_v39 = vadd.f32 %v629_v33, %v628_v30 }
 0x786   :  { %2600 = vmatprep.mubr.msk.bf16.mxu1 %vm640_vm6, %v2679_v40  ;;  %v3442_v40 = vpop.permute.xlu1 %1626 }
 0x78d   :  { %2601 = vmatmul.mubr.msk.bf16.gmra.mrb[68].mxu1 %vm640_vm6, %v2680_v42  ;;  %v631_v42 = vrot.slane %v630_v39, 1 }
 0x78e   :  { %2604 = vmatprep.mubr.msk.bf16.mxu1 %vm640_vm6, %v2681_v43 }
 0x78f   :  { %v632_v43 = vadd.f32 %v631_v42, %v630_v39 }
 0x795   :  { %2605 = vmatmul.mubr.msk.bf16.gmra.mrb[72].mxu1 %vm640_vm6, %v2682_v46  ;;  %v637_v46 = vpop.xlane.xlu1 %636 }
 0x796   :  { %2608 = vmatprep.mubr.msk.bf16.mxu1 %vm640_vm6, %v2683_v48  ;;  %v3446_v48 = vpop.permute.xlu0 %1456  ;;  %v688_v10 = vadd.f32 %v637_v46, %v632_v43 }
 0x79a   :  { %v3448_v5 = vpop.permute.xlu0 %1546 }
 0x79d   :  { %2609 = vmatmul.mubr.msk.bf16.gmra.mrb[76].mxu1 %vm640_vm6, %v2684_v50 }
 0x79e   :  { %v3450_v3 = vpop.permute.xlu0 %1466 }
 0x7ee   :  { %v682_v50 = vpop.f32.mrb[12].mxu1 }
 0x7ef   :  { %v689_v22 = vmul.f32 2.0, %v682_v50  ;;  %v2544_v27 = vpop.f32.mrb[13].mxu1 }
 0x7f0   :  { %v685_v54 = vpop.f32.mrb[14].mxu1 }
 0x7f1   :  { %v690_v7 = vsub.f32 %v688_v10, %v689_v22  ;;  %v2545_v6 = vpop.f32.mrb[15].mxu1 }
 0x7f2   :  { %v3454_v6 = vpop.permute.xlu0 %1636 }
 0x7f3   :  { %v691_v4 = vmax.f32 %v690_v7, 0.0 }
 0x7f5   :  { %v692_v30 = vadd.f32 1.0, %v691_v4 }
 0x7f7   :  { %2697 = vrcp.f32 %v692_v30 }
 0x7f8   :  { %v2550_v33 = vpop.f32.mrb[16].mxu1 }
 0x7f9   :  { %v1137_v2 = vpop.f32.mrb[17].mxu1  ;;  %v1710_v39 = vadd.f32 %v2550_v33, %v3259_v8 }
 0x7fa   :  { %v1392_v42 = vpack.c.bf16 %v1137_v2, %v1137_v2  ;;  %v2551_v1 = vpop.f32.mrb[18].mxu1 }
 0x7fb   :  { %v1140_v0 = vpop.f32.mrb[19].mxu1  ;;  %v1773_v54 = vmax.f32 %v1710_v39, 0.0  ;;  %v1711_v50 = vadd.f32 %v2551_v1, %v1407_v59 }
 0x7fc   :  { %1393 = vst [vmem:[#allocation6] sm:$0xf] %v1392_v42  ;;  %v1709_v43 = vadd.f32 %v3252_v62, %v1140_v0 }
 0x7fd   :  { %v1774_v0 = vmax.f32 %v1711_v50, 0.0 }
 0x7fe   :  { %v1772_v46 = vmax.f32 %v1709_v43, 0.0  ;;  %v3461_v43 = vpop.permute.xlu0 %1556 }
 0x800   :  { %v3456_v7 = vpack.c.bf16 %v1773_v54, %v1772_v46  ;;  %v2554_v4 = vpop.f32.mrb[20].mxu1 }
 0x801   :  { %v2698_v10 = vpop.eup %2697  ;;  %v1153_v22 = vpop.f32.mrb[21].mxu1  ;;  %v1714_v8 = vadd.f32 %v2554_v4, %v3291_v18 }
 0x802   :  { %v694_v27 = vsel %vm644_vm5, %v2698_v10, 0.0  ;;  %v1712_v2 = vadd.f32 %v3277_v14, %v1153_v22  ;;  %v2555_v30 = vpop.f32.mrb[22].mxu1 }
 0x803   :  { %v695_v33 = vrot.slane %v694_v27, 4  ;;  %v1156_v42 = vpop.f32.mrb[23].mxu1  ;;  %v1777_v59 = vmax.f32 %v1714_v8, 0.0  ;;  %v1715_v29 = vadd.f32 %v2555_v30, %v3422_v17 }
 0x804   :  { %v1775_v62 = vmax.f32 %v1712_v2, 0.0  ;;  %v1713_v39 = vadd.f32 %v1417_v9, %v1156_v42  ;;  %v3470_v2 = vpop.permute.xlu0 %1646 }
 0x805   :  { %v696_v1 = vadd.f32 %v695_v33, %v694_v27  ;;  %v1778_v33 = vmax.f32 %v1715_v29, 0.0 }
 0x806   :  { %v3463_v54 = vpack.c.bf16 %v1775_v62, %v1774_v0  ;;  %v1776_v46 = vmax.f32 %v1713_v39, 0.0 }
 0x807   :  { %v697_v19 = vrot.slane %v696_v1, 2 }
 0x808   :  { %v3466_v60 = vpack.c.bf16 %v1777_v59, %v1776_v46  ;;  %v2558_v18 = vpop.f32.mrb[24].mxu1 }
 0x809   :  { %v1169_v14 = vpop.f32.mrb[25].mxu1  ;;  %v698_v4 = vadd.f32 %v697_v19, %v696_v1  ;;  %v1718_v22 = vadd.f32 %v2558_v18, %v3323_v28  ;;  %v3478_v1 = vpop.permute.xlu0 %1566 }
 0x80a   :  { %v1716_v50 = vadd.f32 %v3309_v24, %v1169_v14  ;;  %v2559_v9 = vpop.f32.mrb[26].mxu1 }
 0x80b   :  { %v1172_v27 = vpop.f32.mrb[27].mxu1  ;;  %v699_v8 = vrot.slane %v698_v4, 1  ;;  %v1781_v17 = vmax.f32 %v1718_v22, 0.0  ;;  %v1719_v19 = vadd.f32 %v2559_v9, %v3440_v37 }
 0x80c   :  { %v1779_v42 = vmax.f32 %v1716_v50, 0.0  ;;  %v1717_v0 = vadd.f32 %v3432_v25, %v1172_v27 }
 0x80d   :  { %v700_v62 = vadd.f32 %v699_v8, %v698_v4  ;;  %v1782_v14 = vmax.f32 %v1719_v19, 0.0  ;;  %v3485_v9 = vpop.permute.xlu0 %1656 }
 0x80e   :  { %v3473_v30 = vpack.c.bf16 %v1779_v42, %v1778_v33  ;;  %v1780_v39 = vmax.f32 %v1717_v0, 0.0 }
 0x80f   :  { %2699 = vrcp.f32 %v700_v62 }
 0x810   :  { %v3476_v28 = vpack.c.bf16 %v1781_v17, %v1780_v39  ;;  %v2562_v24 = vpop.f32.mrb[28].mxu1 }
 0x811   :  { %v1185_v59 = vpop.f32.mrb[29].mxu1  ;;  %v1722_v46 = vadd.f32 %v2562_v24, %v3355_v38 }
 0x812   :  { %v1720_v29 = vadd.f32 %v3341_v34, %v1185_v59  ;;  %v2563_v18 = vpop.f32.mrb[30].mxu1 }
 0x813   :  { %v1188_v25 = vpop.f32.mrb[31].mxu1  ;;  %v1785_v50 = vmax.f32 %v1722_v46, 0.0  ;;  %v1723_v8 = vadd.f32 %v2563_v18, %v3450_v3  ;;  %v3493_v46 = vpop.permute.xlu0 %1576 }
 0x814   :  { %v1783_v4 = vmax.f32 %v1720_v29, 0.0  ;;  %v1721_v22 = vadd.f32 %v3446_v48, %v1188_v25 }
 0x815   :  { %v1786_v19 = vmax.f32 %v1723_v8, 0.0 }
 0x816   :  { %v3483_v27 = vpack.c.bf16 %v1783_v4, %v1782_v14  ;;  %v1784_v37 = vmax.f32 %v1721_v22, 0.0 }
 0x818   :  { %v3488_v33 = vpack.c.bf16 %v1785_v50, %v1784_v37  ;;  %v2566_v42 = vpop.f32.mrb[32].mxu1  ;;  %v3500_v50 = vpop.permute.xlu0 %1666 }
 0x819   :  { %v2700_v38 = vpop.eup %2699  ;;  %v1201_v0 = vpop.f32.mrb[33].mxu1  ;;  %v1726_v34 = vadd.f32 %v2566_v42, %v3399_v55 }
 0x81a   :  { %v1724_v62 = vadd.f32 %v3373_v45, %v1201_v0  ;;  %v2567_v17 = vpop.f32.mrb[34].mxu1  ;;  %v702_v39 = vmul.f32 %v2700_v38, %v2698_v10 }
 0x81b   :  { %v1204_v48 = vpop.f32.mrb[35].mxu1  ;;  %v1789_v3 = vmax.f32 %v1726_v34, 0.0  ;;  %v1727_v25 = vadd.f32 %v2567_v17, %v3403_v57 }
 0x81c   :  { %v1787_v24 = vmax.f32 %v1724_v62, 0.0  ;;  %v1725_v59 = vadd.f32 %v3395_v52, %v1204_v48  ;;  %703 = vst [vmem:[#allocation9] sm:$0xf] %v702_v39 }
 0x81d   :  { %v1790_v37 = vmax.f32 %v1727_v25, 0.0 }
 0x81e   :  { %v3495_v29 = vpack.c.bf16 %v1787_v24, %v1786_v19  ;;  %v1788_v18 = vmax.f32 %v1725_v59, 0.0 }
 0x820   :  { %v1843_v14 = vpack.c.bf16 %v1789_v3, %v1788_v18  ;;  %v2570_v55 = vpop.f32.mrb[36].mxu1 }
 0x821   :  { %v1217_v4 = vpop.f32.mrb[37].mxu1  ;;  %v1730_v45 = vadd.f32 %v2570_v55, %v3284_v16 }
 0x822   :  { %v1728_v10 = vadd.f32 %v3268_v11, %v1217_v4  ;;  %v2571_v22 = vpop.f32.mrb[38].mxu1  ;;  %2353 = vmatprep.subr.bf16.mxu0 %v1843_v14  ;;  %v3505_v11 = vpop.permute.xlu0 %1586 }
 0x823   :  { %v1220_v52 = vpop.f32.mrb[39].mxu1  ;;  %2354 = vmatpush3.bf16.msra.mxu0 %v3456_v7  ;;  %v1793_v38 = vmax.f32 %v1730_v45, 0.0  ;;  %v1731_v34 = vadd.f32 %v2571_v22, %v3418_v13 }
 0x824   :  { %v1791_v8 = vmax.f32 %v1728_v10, 0.0  ;;  %v1729_v42 = vadd.f32 %v3409_v61, %v1220_v52 }
 0x825   :  { %v1794_v19 = vmax.f32 %v1731_v34, 0.0 }
 0x826   :  { %v1844_v57 = vpack.c.bf16 %v1791_v8, %v1790_v37  ;;  %v1792_v0 = vmax.f32 %v1729_v42, 0.0  ;;  %v3512_v25 = vpop.permute.xlu0 %1676 }
 0x828   :  { %v1845_v62 = vpack.c.bf16 %v1793_v38, %v1792_v0  ;;  %v2574_v16 = vpop.f32.mrb[40].mxu1  ;;  %2355 = vmatprep.subr.bf16.mxu0 %v1844_v57 }
 0x829   :  { %v1233_v17 = vpop.f32.mrb[41].mxu1  ;;  %2356 = vmatpush3.bf16.msra.mxu0 %v3463_v54  ;;  %v1734_v39 = vadd.f32 %v2574_v16, %v3316_v26 }
 0x82a   :  { %v1732_v7 = vadd.f32 %v3300_v21, %v1233_v17  ;;  %v2575_v48 = vpop.f32.mrb[42].mxu1  ;;  %2357 = vmatprep.subr.bf16.mxu0 %v1845_v62  ;;  %v1597_v52 = vpop.permute.xlu0 %1596 }
 0x82b   :  { %v1236_v61 = vpop.f32.mrb[43].mxu1  ;;  %v1797_v13 = vmax.f32 %v1734_v39, 0.0  ;;  %v1735_v54 = vadd.f32 %v2575_v48, %v3436_v32 }
 0x82c   :  { %v1795_v24 = vmax.f32 %v1732_v7, 0.0  ;;  %v1733_v59 = vadd.f32 %v3426_v20, %v1236_v61 }
 0x82d   :  { %2358 = vmatpush3.bf16.msra.mxu0 %v3466_v60  ;;  %v1798_v45 = vmax.f32 %v1735_v54, 0.0 }
 0x82e   :  { %v1846_v3 = vpack.c.bf16 %v1795_v24, %v1794_v19  ;;  %v1796_v18 = vmax.f32 %v1733_v59, 0.0 }
 0x830   :  { %v1847_v14 = vpack.c.bf16 %v1797_v13, %v1796_v18  ;;  %v2578_v26 = vpop.f32.mrb[44].mxu1  ;;  %2359 = vmatprep.subr.bf16.mxu0 %v1846_v3 }
 0x831   :  { %v1249_v21 = vpop.f32.mrb[45].mxu1  ;;  %2360 = vmatpush3.bf16.msra.mxu0 %v3473_v30  ;;  %v1738_v55 = vadd.f32 %v2578_v26, %v3348_v36 }
 0x832   :  { %v1736_v4 = vadd.f32 %v3332_v31, %v1249_v21  ;;  %v2579_v20 = vpop.f32.mrb[46].mxu1  ;;  %2361 = vmatprep.subr.bf16.mxu0 %v1847_v14 }
 0x833   :  { %v1252_v60 = vpop.f32.mrb[47].mxu1  ;;  %v1801_v32 = vmax.f32 %v1738_v55, 0.0  ;;  %v1739_v42 = vadd.f32 %v2579_v20, %v3448_v5 }
 0x834   :  { %v1799_v10 = vmax.f32 %v1736_v4, 0.0  ;;  %v1737_v22 = vadd.f32 %v3444_v44, %v1252_v60  ;;  %v3524_v44 = vpop.permute.xlu0 %1686 }
 0x835   :  { %2362 = vmatpush3.bf16.msra.mxu0 %v3476_v28  ;;  %v1802_v34 = vmax.f32 %v1739_v42, 0.0 }
 0x836   :  { %v1848_v37 = vpack.c.bf16 %v1799_v10, %v1798_v45  ;;  %v1800_v8 = vmax.f32 %v1737_v22, 0.0 }
 0x838   :  { %v1849_v30 = vpack.c.bf16 %v1801_v32, %v1800_v8  ;;  %v2582_v38 = vpop.f32.mrb[48].mxu1  ;;  %2363 = vmatprep.subr.bf16.mxu0 %v1848_v37  ;;  %v1607_v48 = vpop.permute.xlu0 %1606 }
 0x839   :  { %v1265_v36 = vpop.f32.mrb[49].mxu1  ;;  %2364 = vmatpush3.bf16.msra.mxu0 %v3483_v27  ;;  %v1742_v31 = vadd.f32 %v2582_v38, %v3387_v49 }
 0x83a   :  { %v1740_v57 = vadd.f32 %v3364_v41, %v1265_v36  ;;  %v2583_v0 = vpop.f32.mrb[50].mxu1  ;;  %2365 = vmatprep.subr.bf16.mxu0 %v1849_v30  ;;  %v2685_v41 = vld [vmem:[%s3669_s8] ss:$16 sps:$4 sm:$0xff]  }
 0x83b   :  { %v1268_v28 = vpop.f32.mrb[51].mxu1  ;;  %v1805_v5 = vmax.f32 %v1742_v31, 0.0  ;;  %v1743_v27 = vadd.f32 %v2583_v0, %v3478_v1 }
 0x83c   :  { %v1803_v62 = vmax.f32 %v1740_v57, 0.0  ;;  %v1741_v16 = vadd.f32 %v3461_v43, %v1268_v28  ;;  %v2688_v43 = vld [vmem:[%s3669_s8 + $0x24] ss:$16 sps:$4 sm:$0xff]   ;;  %v3543_v14 = vpop.permute.xlu0 %1696 }
 0x83d   :  { %2366 = vmatpush3.bf16.msra.mxu0 %v3488_v33  ;;  %v1806_v59 = vmax.f32 %v1743_v27, 0.0 }
 0x83e   :  { %v1850_v17 = vpack.c.bf16 %v1803_v62, %v1802_v34  ;;  %v1804_v39 = vmax.f32 %v1741_v16, 0.0 }
 0x840   :  { %v3529_v7 = vpack.c.bf16 %v1805_v5, %v1804_v39  ;;  %v2586_v49 = vpop.f32.mrb[52].mxu1  ;;  %2367 = vmatprep.subr.bf16.mxu0 %v1850_v17  ;;  %v1617_v32 = vpop.permute.xlu0 %1616 }
 0x841   :  { %v1281_v61 = vpop.f32.mrb[53].mxu1  ;;  %2368 = vmatpush3.bf16.msra.mxu0 %v3495_v29  ;;  %v1746_v33 = vadd.f32 %v2586_v49, %v3405_v58 }
 0x842   :  { %v1744_v1 = vadd.f32 %v3397_v53, %v1281_v61  ;;  %v2587_v19 = vpop.f32.mrb[54].mxu1  ;;  %v2690_v53 = vld [vmem:[%s3669_s8 + $0x20] ss:$16 sps:$4 sm:$0xff]  }
 0x843   :  { %v1284_v24 = vpop.f32.mrb[55].mxu1  ;;  %v1809_v18 = vmax.f32 %v1746_v33, 0.0  ;;  %v1747_v26 = vadd.f32 %v2587_v19, %v3505_v11 }
 0x844   :  { %v1807_v13 = vmax.f32 %v1744_v1, 0.0  ;;  %v1745_v3 = vadd.f32 %v3493_v46, %v1284_v24  ;;  %1969 = vmatmul.mubr.bf16.vlgmr.msra.gmra.mrb[28].mxu0 %v2685_v41  ;;  %v2693_v46 = vld [vmem:[%s3669_s8 + $0xc] ss:$16 sps:$4 sm:$0xff]   ;;  %v3563_v0 = vpop.permute.xlu0 %1706 }
 0x845   :  { %1976 = vmatprep.mubr.bf16.mxu0 %v2688_v43  ;;  %v1810_v11 = vmax.f32 %v1747_v26, 0.0 }
 0x846   :  { %v3541_v54 = vpack.c.bf16 %v1807_v13, %v1806_v59  ;;  %v1808_v29 = vmax.f32 %v1745_v3, 0.0 }
 0x848   :  { %v3546_v21 = vpack.c.bf16 %v1809_v18, %v1808_v29  ;;  %v2590_v58 = vpop.f32.mrb[56].mxu1  ;;  %v1632_v41 = vpop.permute.xlu0 %1631 }
 0x849   :  { %v1297_v55 = vpop.f32.mrb[57].mxu1  ;;  %v1750_v4 = vadd.f32 %v2590_v58, %v3420_v15 }
 0x84a   :  { %v1748_v20 = vadd.f32 %v3411_v63, %v1297_v55  ;;  %v2591_v60 = vpop.f32.mrb[58].mxu1 }
 0x84b   :  { %v1300_v45 = vpop.f32.mrb[59].mxu1  ;;  %v1813_v37 = vmax.f32 %v1750_v4, 0.0  ;;  %v1751_v30 = vadd.f32 %v2591_v60, %v1607_v48 }
 0x84c   :  { %v1811_v10 = vmax.f32 %v1748_v20, 0.0  ;;  %v1749_v22 = vadd.f32 %v1597_v52, %v1300_v45  ;;  %1977 = vmatmul.mubr.bf16.gmra.mrb[32].mxu0 %v2690_v53 }
 0x84d   :  { %2258 = vmatprep.mubr.msk.bf16.mxu0 %vm1925_vm7, %v2693_v46  ;;  %v1814_v28 = vmax.f32 %v1751_v30, 0.0 }
 0x84e   :  { %v3557_v8 = vpack.c.bf16 %v1811_v10, %v1810_v11  ;;  %v1812_v42 = vmax.f32 %v1749_v22, 0.0  ;;  %v3696_v10 = vld [vmem:[#allocation24_spill] sm:$0xff] }
 0x850   :  { %v3559_v38 = vpack.c.bf16 %v1813_v37, %v1812_v42  ;;  %v2594_v15 = vpop.f32.mrb[60].mxu1 }
 0x851   :  { %v1313_v36 = vpop.f32.mrb[61].mxu1  ;;  %v1754_v63 = vadd.f32 %v2594_v15, %v3438_v35 }
 0x852   :  { %v1752_v31 = vadd.f32 %v3430_v23, %v1313_v36  ;;  %v2595_v57 = vpop.f32.mrb[62].mxu1 }
 0x853   :  { %v1316_v52 = vpop.f32.mrb[63].mxu1  ;;  %v1817_v16 = vmax.f32 %v1754_v63, 0.0  ;;  %v1755_v39 = vadd.f32 %v2595_v57, %v3442_v40 }
 0x854   :  { %v1815_v34 = vmax.f32 %v1752_v31, 0.0  ;;  %v1753_v62 = vadd.f32 %v1617_v32, %v1316_v52  ;;  %v3697_v31 = vld [vmem:[#allocation26_spill] sm:$0xff]  ;;  %v3698_v52 = vld [vmem:[#allocation25_spill] sm:$0xff] }
 0x855   :  { %v1818_v33 = vmax.f32 %v1755_v39, 0.0 }
 0x856   :  { %v3565_v5 = vpack.c.bf16 %v1815_v34, %v1814_v28  ;;  %v1816_v17 = vmax.f32 %v1753_v62, 0.0 }
 0x858   :  { %v3568_v27 = vpack.c.bf16 %v1817_v16, %v1816_v17  ;;  %v2598_v49 = vpop.f32.mrb[64].mxu1 }
 0x859   :  { %v1329_v35 = vpop.f32.mrb[65].mxu1  ;;  %v1758_v23 = vadd.f32 %v2598_v49, %v3380_v47 }
 0x85a   :  { %v1756_v48 = vadd.f32 %v1632_v41, %v1329_v35  ;;  %v2599_v61 = vpop.f32.mrb[66].mxu1 }
 0x85b   :  { %v1332_v43 = vpop.f32.mrb[67].mxu1  ;;  %v1821_v24 = vmax.f32 %v1758_v23, 0.0  ;;  %v1759_v40 = vadd.f32 %v2599_v61, %v3470_v2  ;;  %v3701_v23 = vld [vmem:[#allocation17_spill] sm:$0xff]  ;;  %v3703_v61 = vld [vmem:[#allocation19_spill] sm:$0xff] }
 0x85c   :  { %v1819_v1 = vmax.f32 %v1756_v48, 0.0  ;;  %v1757_v19 = vadd.f32 %v3454_v6, %v1332_v43  ;;  %v3702_v48 = vld [vmem:[#allocation18_spill] sm:$0xff]  ;;  %v3704_v43 = vld [vmem:[#allocation20_spill] sm:$0xff] }
 0x85d   :  { %v1822_v55 = vmax.f32 %v1759_v40, 0.0 }
 0x85e   :  { %v3572_v59 = vpack.c.bf16 %v1819_v1, %v1818_v33  ;;  %v1820_v13 = vmax.f32 %v1757_v19, 0.0  ;;  %v3705_v33 = vld [vmem:[#allocation21_spill] sm:$0xff]  ;;  %v3706_v1 = vld [vmem:[#allocation22_spill] sm:$0xff]  ;;  %v3707_v19 = vld [vmem:[#allocation23_spill] sm:$0xff] }
 0x860   :  { %v1859_v3 = vpack.c.bf16 %v1821_v24, %v1820_v13  ;;  %v2602_v18 = vpop.f32.mrb[68].mxu1  ;;  %v2042_v24 = vld [vmem:[#allocation6] sm:$0xf] }
 0x861   :  { %v1345_v29 = vpop.f32.mrb[69].mxu1  ;;  %v1762_v26 = vadd.f32 %v2602_v18, %v3401_v56 }
 0x862   :  { %v1760_v47 = vadd.f32 %v3393_v51, %v1345_v29  ;;  %v2603_v58 = vpop.f32.mrb[70].mxu1  ;;  %2381 = vmatprep.subr.bf16.mxu0 %v1859_v3 }
 0x863   :  { %v1348_v53 = vpop.f32.mrb[71].mxu1  ;;  %2382 = vmatpush3.bf16.msra.mxu0 %v3529_v7  ;;  %v1825_v4 = vmax.f32 %v1762_v26, 0.0  ;;  %v1763_v2 = vadd.f32 %v2603_v58, %v3500_v50 }
 0x864   :  { %v1823_v6 = vmax.f32 %v1760_v47, 0.0  ;;  %v1761_v46 = vadd.f32 %v3485_v9, %v1348_v53 }
 0x865   :  { %v1826_v37 = vmax.f32 %v1763_v2, 0.0 }
 0x866   :  { %v1860_v20 = vpack.c.bf16 %v1823_v6, %v1822_v55  ;;  %v1824_v60 = vmax.f32 %v1761_v46, 0.0 }
 0x868   :  { %v1861_v45 = vpack.c.bf16 %v1825_v4, %v1824_v60  ;;  %v2606_v11 = vpop.f32.mrb[72].mxu1  ;;  %2383 = vmatprep.subr.bf16.mxu0 %v1860_v20 }
 0x869   :  { %v1361_v56 = vpop.f32.mrb[73].mxu1  ;;  %2384 = vmatpush3.bf16.msra.mxu0 %v3541_v54  ;;  %v1766_v51 = vadd.f32 %v2606_v11, %v3416_v12 }
 0x86a   :  { %v1764_v22 = vadd.f32 %v3696_v10, %v1361_v56  ;;  %v2607_v7 = vpop.f32.mrb[74].mxu1  ;;  %2385 = vmatprep.subr.bf16.mxu0 %v1861_v45 }
 0x86b   :  { %v1364_v32 = vpop.f32.mrb[75].mxu1  ;;  %v1829_v50 = vmax.f32 %v1766_v51, 0.0  ;;  %v1767_v36 = vadd.f32 %v2607_v7, %v3524_v44 }
 0x86c   :  { %v1827_v9 = vmax.f32 %v1764_v22, 0.0  ;;  %v1765_v42 = vadd.f32 %v3512_v25, %v1364_v32 }
 0x86d   :  { %2386 = vmatpush3.bf16.msra.mxu0 %v3546_v21  ;;  %v1830_v62 = vmax.f32 %v1767_v36, 0.0 }
 0x86e   :  { %v1862_v30 = vpack.c.bf16 %v1827_v9, %v1826_v37  ;;  %v1828_v15 = vmax.f32 %v1765_v42, 0.0 }
 0x870   :  { %v1863_v63 = vpack.c.bf16 %v1829_v50, %v1828_v15  ;;  %v2610_v54 = vpop.f32.mrb[76].mxu1  ;;  %2387 = vmatprep.subr.bf16.mxu0 %v1862_v30 }
 0x871   :  { %v1377_v12 = vpop.f32.mrb[77].mxu1  ;;  %2388 = vmatpush3.bf16.msra.mxu0 %v3557_v8  ;;  %v1770_v57 = vadd.f32 %v2610_v54, %v3697_v31 }
 0x872   :  { %v1768_v28 = vadd.f32 %v3698_v52, %v1377_v12  ;;  %v2611_v34 = vpop.f32.mrb[78].mxu1  ;;  %2389 = vmatprep.subr.bf16.mxu0 %v1863_v63 }
 0x873   :  { %v1380_v25 = vpop.f32.mrb[79].mxu1  ;;  %v1771_v16 = vadd.f32 %v2611_v34, %v3563_v0  ;;  %v1833_v44 = vmax.f32 %v1770_v57, 0.0  ;;  %v3699_v0 = vmov 0.0  }
 0x874   :  { %v1831_v21 = vmax.f32 %v1768_v28, 0.0  ;;  %v1769_v17 = vadd.f32 %v3543_v14, %v1380_v25  ;;  %v2691_v14 = vld [vmem:[%s3669_s8 + $0x8] ss:$16 sps:$4 sm:$0xff]  }
 0x875   :  { %2390 = vmatpush3.bf16.msra.mxu0 %v3559_v38  ;;  %v1834_v41 = vmax.f32 %v1771_v16, 0.0  ;;  %v2694_v38 = vld [vmem:[%s3669_s8 + $0x2c] ss:$16 sps:$4 sm:$0xff]  }
 0x876   :  { %v1864_v39 = vpack.c.bf16 %v1831_v21, %v1830_v62  ;;  %v1832_v49 = vmax.f32 %v1769_v17, 0.0 }
 0x877   :  { %v1866_v35 = vpack.c.bf16 %v1834_v41, %v1834_v41 }
 0x878   :  { %v1865_v8 = vpack.c.bf16 %v1833_v44, %v1832_v49  ;;  %2391 = vmatprep.subr.bf16.mxu0 %v1864_v39 }
 0x879   :  { %2392 = vmatpush3.bf16.msra.mxu0 %v3565_v5  ;;  %v3700_v5 = vld [vmem:[#allocation16_spill] sm:$0xff] }
 0x87a   :  { %2393 = vmatprep.subr.bf16.mxu0 %v1865_v8 }
 0x87d   :  { %2394 = vmatpush3.bf16.msra.mxu0 %v3568_v27  ;;  %v2696_v27 = vld [vmem:[%s3669_s8 + $0x28] ss:$16 sps:$4 sm:$0xff]   ;;  %s2780_s8 = smov [#allocation9]  }
 0x87e   :  { %2633 = vmatprep.subr.msk.bf16.mxu0 %vm1932_vm8, %v1866_v35  ;;  %s2129_s9 = sshll.u32 %s2780_s8, 4  ;;  %s2130_s9 = int_to_ptr.vmem [resolvable:$true] %s2129_s9 }
 0x87f   :  { %s2705_s3 = scalar_lea.vmem %s2130_s9, 64  ;;  %p2710_p1 = scmp.lt.s32.totalorder %s2130_s9, %s2130_s9 }
 0x880   :  { %p2706_p0 = scmp.ne.s32.totalorder %s2130_s9, %s2705_s3  ;;  %p2711_p2 = scmp.lt.s32.totalorder %s2705_s3, %s2705_s3 }
 0x881   :  { %2396 = vmatpush3.bf16.msra.mxu0 %v3572_v59 }
 0x882   :  { %2612 = vmatprep.subr.bf16.mxu0 %v3699_v0  ;;  %p2712_p3 = por %p2711_p2, %p2710_p1 }
 0x884   :  { %2018 = vmatmul.mubr.bf16.vlgmr.msra.gmra.mrb[36].mxu0 %v2691_v14  ;;  %p2713_p4 = pnand %p2712_p3, %p2706_p0 }
 0x885   :  { %2613 = vmatpush3.bf16.msra.mxu0 %v3700_v5  ;;  %2259 = vmatprep.mubr.msk.bf16.mxu0 %vm1925_vm7, %v2694_v38 }
 0x886   :  { %2614 = vmatprep.subr.bf16.mxu0 %v3699_v0 }
 0x889   :  { %2615 = vmatpush3.bf16.msra.mxu0 %v3701_v23 }
 0x88a   :  { %2616 = vmatprep.subr.bf16.mxu0 %v3699_v0 }
 0x88c   :  { %2026 = vmatmul.mubr.bf16.gmra.mrb[40].mxu0 %v2696_v27 }
 0x88d   :  { %2617 = vmatpush3.bf16.msra.mxu0 %v3702_v48  ;;  %2628 = vmatprep.mubr.msk.bf16.mxu0 %vm2778_vm2, %v3699_v0 }
 0x88e   :  { %2618 = vmatprep.subr.bf16.mxu0 %v3699_v0 }
 0x891   :  { %2619 = vmatpush3.bf16.msra.mxu0 %v3703_v61 }
 0x892   :  { %2620 = vmatprep.subr.bf16.mxu0 %v3699_v0 }
 0x895   :  { %2621 = vmatpush3.bf16.msra.mxu0 %v3704_v43 }
 0x896   :  { %2622 = vmatprep.subr.bf16.mxu0 %v3699_v0 }
 0x899   :  { %2623 = vmatpush3.bf16.msra.mxu0 %v3705_v33 }
 0x89a   :  { %2624 = vmatprep.subr.bf16.mxu0 %v3699_v0 }
 0x89d   :  { %2625 = vmatpush3.bf16.msra.mxu0 %v3706_v1 }
 0x89e   :  { %2626 = vmatprep.subr.bf16.mxu0 %v3699_v0 }
 0x8a1   :  { %2627 = vmatpush3.bf16.msra.mxu0 %v3707_v19 }
 0x8a4   :  { %2629 = vmatmul.mubr.bf16.vlgmr.msra.gmra.mrb[44].mxu0 %v2042_v24 }
 0x917   :  { %v2369_v59 = vpop.f32.mrb[28].mxu0 }
 0x918   :  { %v2370_v13 = vpop.f32.mrb[29].mxu0 }
 0x919   :  { %v2371_v40 = vadd.f32 %v2370_v13, %v2369_v59  ;;  %v2372_v3 = vpop.f32.mrb[30].mxu0 }
 0x91a   :  { %v2373_v18 = vpop.f32.mrb[31].mxu0 }
 0x91b   :  { %v2374_v29 = vadd.f32 %v2373_v18, %v2372_v3 }
 0x91f   :  { %v2375_v26 = vpop.f32.mrb[32].mxu0 }
 0x920   :  { %v2376_v47 = vpop.f32.mrb[33].mxu0 }
 0x921   :  { %2716 = shalt.err (!%p2713_p4)
}
 0x922   :  { %s2717_s22 = scalar_lea.hbm %s3673_s12, 64 }
 0x923   :  { %p2718_p5 = scmp.ne.s32.totalorder %s3673_s12, %s2717_s22  ;;  %p2721_p6 = scmp.lt.u32.totalorder %s2717_s22, %s3673_s12 }
 0x925   :  { %p2723_p7 = pnand %p2721_p6, %p2718_p5 }
 0x927   :  { %2726 = shalt.err (!%p2723_p7)
}
 0x928   :  { %2132 = dma.vmem_to_hbm [thread:$0]  %s2130_s9, 64, %s3673_s12, [#allocation10]   ;;  %v2377_v58 = vadd.f32 %v2376_v47, %v2375_v26  ;;  %v2378_v53 = vpop.f32.mrb[34].mxu0  ;;  %v1870_v46 = vpop.permute.xlu0 %1869 }
 0x929   :  { %v2379_v55 = vpop.f32.mrb[35].mxu0  ;;  %v1971_v2 = vadd.f32 %v2371_v40, %v1870_v46  ;;  %s2781_s12 = smov [#allocation7]  }
 0x92a   :  { %v2380_v6 = vadd.f32 %v2379_v55, %v2378_v53  ;;  %s2116_s6 = sshll.u32 %s2781_s12, 4  ;;  %s2117_s6 = int_to_ptr.vmem [resolvable:$true] %s2116_s6 }
 0x92b   :  { %s2727_s28 = scalar_lea.vmem %s2117_s6, 512  ;;  %p2732_p9 = scmp.lt.s32.totalorder %s2117_s6, %s2117_s6 }
 0x92c   :  { %v1875_v4 = vpop.permute.xlu0 %1874  ;;  %p2728_p8 = scmp.ne.s32.totalorder %s2117_s6, %s2727_s28  ;;  %p2733_p10 = scmp.lt.s32.totalorder %s2727_s28, %s2727_s28 }
 0x92d   :  { %v1974_v51 = vadd.f32 %v2374_v29, %v1875_v4 }
 0x92e   :  { %p2734_p11 = por %p2733_p10, %p2732_p9 }
 0x930   :  { %v1880_v7 = vpop.permute.xlu0 %1879  ;;  %p2735_p12 = pnand %p2734_p11, %p2728_p8 }
 0x931   :  { %v1979_v30 = vadd.f32 %v2377_v58, %v1880_v7 }
 0x934   :  { %v1885_v63 = vpop.permute.xlu0 %1884 }
 0x935   :  { %v1982_v12 = vadd.f32 %v2380_v6, %v1885_v63 }
 0x957   :  { %v2397_v20 = vpop.f32.mrb[36].mxu0 }
 0x958   :  { %v2398_v60 = vpop.f32.mrb[37].mxu0 }
 0x959   :  { %v2399_v45 = vadd.f32 %v2398_v60, %v2397_v20  ;;  %v2400_v11 = vpop.f32.mrb[38].mxu0 }
 0x95a   :  { %v2401_v56 = vpop.f32.mrb[39].mxu0 }
 0x95b   :  { %v2020_v10 = vadd.f32 %v2399_v45, %v1971_v2  ;;  %v2402_v22 = vadd.f32 %v2401_v56, %v2400_v11 }
 0x95d   :  { %v2034_v32 = vmax.f32 %v2020_v10, 0.0  ;;  %v2023_v37 = vadd.f32 %v2402_v22, %v1974_v51 }
 0x95f   :  { %2038 = vst [vmem:[#allocation7] sm:$0xff] %v2034_v32  ;;  %v2035_v9 = vmax.f32 %v2023_v37, 0.0  ;;  %v2403_v42 = vpop.f32.mrb[40].mxu0 }
 0x960   :  { %v2404_v50 = vpop.f32.mrb[41].mxu0 }
 0x961   :  { %2039 = vst [vmem:[#allocation7 + $0x8] sm:$0xff] %v2035_v9  ;;  %v2405_v15 = vadd.f32 %v2404_v50, %v2403_v42  ;;  %v2406_v36 = vpop.f32.mrb[42].mxu0 }
 0x962   :  { %v2407_v54 = vpop.f32.mrb[43].mxu0 }
 0x963   :  { %v2028_v31 = vadd.f32 %v2405_v15, %v1979_v30  ;;  %v2408_v57 = vadd.f32 %v2407_v54, %v2406_v36 }
 0x965   :  { %v2036_v52 = vmax.f32 %v2028_v31, 0.0  ;;  %v2031_v28 = vadd.f32 %v2408_v57, %v1982_v12 }
 0x967   :  { %2040 = vst [vmem:[#allocation7 + $0x10] sm:$0xff] %v2036_v52  ;;  %v2037_v34 = vmax.f32 %v2031_v28, 0.0 }
 0x969   :  { %2041 = vst [vmem:[#allocation7 + $0x18] sm:$0xff] %v2037_v34 }
 0x96a   :  { %2738 = shalt.err (!%p2735_p12)
}
 0x96b   :  { %s2739_s30 = scalar_lea.hbm %s3672_s11, 512 }
 0x96c   :  { %p2740_p13 = scmp.ne.s32.totalorder %s3672_s11, %s2739_s30  ;;  %p2743_p0 = scmp.lt.u32.totalorder %s2739_s30, %s3672_s11 }
 0x96e   :  { %p2745_p1 = pnand %p2743_p0, %p2740_p13 }
 0x970   :  { %2748 = shalt.err (!%p2745_p1)
}
 0x971   :  { %s2782_s5 = smov 128   ;;  %s2783_s10 = smov 8  }
 0x972   :  { %2122 = dma.vmem_to_hbm [thread:$0]  %s2117_s6, 512, %s3672_s11, [#allocation8], %s2782_s5, %s2782_s5, %s2783_s10  }
 0x973   :  { %s2784_s11 = smov [#allocation11]  }
 0x974   :  { %s2139_s18 = sshll.u32 %s2784_s11, 4  ;;  %s2140_s18 = int_to_ptr.vmem [resolvable:$true] %s2139_s18 }
 0x975   :  { %s2749_s19 = scalar_lea.vmem %s2140_s18, 64  ;;  %p2754_p3 = scmp.lt.s32.totalorder %s2140_s18, %s2140_s18 }
 0x976   :  { %p2750_p2 = scmp.ne.s32.totalorder %s2140_s18, %s2749_s19  ;;  %p2755_p4 = scmp.lt.s32.totalorder %s2749_s19, %s2749_s19 }
 0x977   :  { %v2085_v25 = vpop.f32.mrb[44].mxu0 }
 0x978   :  { %v2091_v62 = vsel %vm644_vm5, %v2085_v25, -inf  ;;  %v2630_v21 = vpop.f32.mrb[45].mxu0  ;;  %p2756_p5 = por %p2755_p4, %p2754_p3 }
 0x979   :  { %v2092_v16 = vrot.slane %v2091_v62, 4  ;;  %v2088_v17 = vpop.f32.mrb[46].mxu0 }
 0x97a   :  { %v2631_v44 = vpop.f32.mrb[47].mxu0  ;;  %p2757_p6 = pnand %p2756_p5, %p2750_p2 }
 0x97b   :  { %v2093_v39 = vmax.f32 %v2091_v62, %v2092_v16 }
 0x97d   :  { %v2094_v49 = vrot.slane %v2093_v39, 2 }
 0x97f   :  { %v2095_v41 = vmax.f32 %v2093_v39, %v2094_v49 }
 0x981   :  { %v2096_v8 = vrot.slane %v2095_v41, 1 }
 0x983   :  { %v2097_v35 = vmax.f32 %v2095_v41, %v2096_v8 }
 0x985   :  { %v2098_v14 = vsub.f32 %v2085_v25, %v2097_v35 }
 0x987   :  { %v2099_v38 = vmul.f32 1.442695, %v2098_v14 }
 0x989   :  { %2701 = vpow2.f32 %v2099_v38 }
 0x993   :  { %v2702_v0 = vpop.eup %2701 }
 0x994   :  { %v2101_v5 = vsel %vm644_vm5, %v2702_v0, 0.0 }
 0x995   :  { %v2102_v27 = vrot.slane %v2101_v5, 4 }
 0x997   :  { %v2103_v23 = vadd.f32 %v2102_v27, %v2101_v5 }
 0x999   :  { %v2104_v48 = vrot.slane %v2103_v23, 2 }
 0x99b   :  { %v2105_v61 = vadd.f32 %v2104_v48, %v2103_v23 }
 0x99d   :  { %v2106_v43 = vrot.slane %v2105_v61, 1 }
 0x99f   :  { %v2107_v33 = vadd.f32 %v2106_v43, %v2105_v61 }
 0x9a1   :  { %2703 = vrcp.f32 %v2107_v33 }
 0x9ab   :  { %v2704_v1 = vpop.eup %2703 }
 0x9ac   :  { %v2109_v19 = vmul.f32 %v2704_v1, %v2702_v0 }
 0x9ae   :  { %2110 = vst [vmem:[#allocation11] sm:$0xf] %v2109_v19 }
 0x9af   :  { %2760 = shalt.err (!%p2757_p6)
}
 0x9b0   :  { %s2761_s9 = scalar_lea.hbm %s3674_s13, 64 }
 0x9b1   :  { %p2762_p7 = scmp.ne.s32.totalorder %s3674_s13, %s2761_s9  ;;  %p2765_p8 = scmp.lt.u32.totalorder %s2761_s9, %s3674_s13 }
 0x9b3   :  { %p2767_p9 = pnand %p2765_p8, %p2762_p7 }
 0x9b5   :  { %2770 = shalt.err (!%p2767_p9)
}
 0x9b6   :  { %2142 = dma.vmem_to_hbm [thread:$0]  %s2140_s18, 64, %s3674_s13, [#allocation10]  }
 0x9b7   :  { %2773 = dma.done.wait [#allocation8], 512  }
 0x9b8   :  { %2774 = vsyncadd [#allocation8], 4294966784 }
 0x9b9   :  { %2775 = dma.done.wait [#allocation10], 128  }
 0x9ba   :  { %2776 = vsyncadd [#allocation10], 4294967168 }
 0x9bb   :  { %2152 = vsyncpa [#allocation8], 1 }
 0x9bc   :  { %2153 = vsyncpa [#allocation10], 1 }
 0x9bd   :  { %2154 = vsyncmov [#allocation3] }
 0x9c0   :  { %s2155_s24 = vpop.sfrf %2154 }
 0x9c1   :  { %p2260_p10 = scmp.ne.s32.totalorder %s2155_s24, 0 }
 0x9c3   :  { %2159 = shalt.err (%p2260_p10)  }

</bundles_post_ra>
